<compile_context>
chip_gen: v7x
topology: tpu7x:2x2x1
jax: 0.10.0
libtpu: 0.0.40
codegen_flags: <defaults>
</compile_context>

<pallas_src>
import jax
import jax.numpy as jnp
import numpy as np
from jax import lax
from jax.experimental import pallas as pl
from jax.experimental.pallas import tpu as pltpu

# ----------------------------- configuration ---------------------------------

N_FFT = 32
HOP = N_FFT // 4            # 8
N_FREQ = N_FFT // 2 + 1     # 17
F_PAD = 24                  # N_FREQ padded up to a multiple of 8 (sublane alignment)
N_TAPS = N_FFT // HOP       # 4 overlapping HOP-blocks per frame

FEAT_CH = (8, 16, 32)       # synthetic VGG-like stage widths (multiples of 8)

# LPIPS ScalingLayer constants
LPIPS_SHIFT = np.array([-0.030, -0.088, -0.188], dtype=np.float32)
LPIPS_SCALE = np.array([0.458, 0.448, 0.450], dtype=np.float32)

VMEM_LIMIT = 32 * 1024 * 1024   # safe on v5e/v6e (128 MiB) and v7x (64 MiB physical)


def _round_up(x, m):
    return ((x + m - 1) // m) * m


def _pick_tile(m, want, min_steps=2):
    # Largest 128-aligned m-tile <= want, but keep >= min_steps grid steps when possible
    # so v7x's two TensorCores both get work; one extra step costs ~0.35us on 1-TC chips.
    t = min(_round_up(want, 128), _round_up(m, 128))
    while t > 128 and pl.cdiv(m, t) < min_steps:
        t = _round_up(t // 2, 128)
    return t


# ----------------------------- Pallas kernels --------------------------------

def _stft_mag_kernel(dft_ref, b_ref, o_ref):
    # dft: (2*F_PAD, n_fft) packed [cos ; -sin] with hann window & 1/sqrt(n_fft) folded in
    # b:   (1, HOP, NB_PAD) HOP-sample blocks of one reflect-padded audio row
    # o:   (1, F_PAD, FR_PAD) lane-dense magnitudes
    fr = o_ref.shape[-1]
    # frame f = blocks f..f+3  ->  assemble (n_fft, fr) operand from 4 shifted slices
    taps = [b_ref[0, :, j:j + fr] for j in range(N_TAPS)]
    cols = jnp.concatenate(taps, axis=0)                       # (n_fft, fr)
    y = jnp.dot(dft_ref[...], cols, preferred_element_type=jnp.float32)
    re = y[:F_PAD, :]
    im = y[F_PAD:, :]
    o_ref[0] = jnp.sqrt(re * re + im * im)


def stft_mag_pallas(rows, dftw):
    # rows: (R, T) audio rows -> (R, F_PAD, FR_PAD) magnitudes (f32), plus n_frames.
    R, T = rows.shape
    pad = N_FFT // 2
    xp = jnp.pad(rows, ((0, 0), (pad, pad)), mode="reflect")   # torch.stft center/reflect
    t_pad = T + 2 * pad
    n_frames = 1 + (t_pad - N_FFT) // HOP
    fr_pad = _round_up(n_frames, 128)
    nb = pl.cdiv(t_pad, HOP)
    nb_pad = fr_pad + 128                                      # >= fr_pad + 3 and 128-aligned
    xp = jnp.pad(xp, ((0, 0), (0, nb * HOP - t_pad)))
    blocks = jnp.transpose(xp.reshape(R, nb, HOP), (0, 2, 1))  # (R, HOP, nb)  ~1x data
    blocks = jnp.pad(blocks, ((0, 0), (0, 0), (0, nb_pad - nb)))
    out = pl.pallas_call(
        _stft_mag_kernel,
        out_shape=jax.ShapeDtypeStruct((R, F_PAD, fr_pad), jnp.float32),
        grid=(R,),
        in_specs=[
            pl.BlockSpec((2 * F_PAD, N_FFT), lambda r: (0, 0)),      # whole packed DFT
            pl.BlockSpec((1, HOP, nb_pad), lambda r: (r, 0, 0)),     # one row's blocks
        ],
        out_specs=pl.BlockSpec((1, F_PAD, fr_pad), lambda r: (r, 0, 0)),
        compiler_params=pltpu.CompilerParams(
            dimension_semantics=("parallel",),
            vmem_limit_bytes=VMEM_LIMIT),
    )(dftw, blocks)
    return out, n_frames


def _conv_mm_kernel(w_ref, x_ref, b_ref, o_ref):
    # w: (Cout, 9*Cin), x: (9*Cin, tile_m) im2col columns, b: (Cout, 1)
    y = jnp.dot(w_ref[...], x_ref[...], preferred_element_type=jnp.float32)
    o_ref[...] = jnp.maximum(y + b_ref[...], 0.0).astype(o_ref.dtype)


def conv_mm_pallas(w_mat, x_col, b, tile_m=1024):
    c_out, K = w_mat.shape
    M = x_col.shape[1]
    tile = _pick_tile(M, tile_m)
    m_pad = _round_up(M, tile)
    x = jnp.pad(x_col, ((0, 0), (0, m_pad - M))).astype(jnp.bfloat16)
    w = w_mat.astype(jnp.bfloat16)
    b2 = b.reshape(c_out, 1).astype(jnp.float32)
    out = pl.pallas_call(
        _conv_mm_kernel,
        out_shape=jax.ShapeDtypeStruct((c_out, m_pad), jnp.bfloat16),   # bf16 writeback
        grid=(m_pad // tile,),
        in_specs=[
            pl.BlockSpec((c_out, K), lambda i: (0, 0)),          # whole weight matrix
            pl.BlockSpec((K, tile), lambda i: (0, i)),           # tiled over pixels
            pl.BlockSpec((c_out, 1), lambda i: (0, 0)),
        ],
        out_specs=pl.BlockSpec((c_out, tile), lambda i: (0, i)),
        compiler_params=pltpu.CompilerParams(
            dimension_semantics=("parallel",),
            vmem_limit_bytes=VMEM_LIMIT),
    )(w, x, b2)
    return out[:, :M]     # padded columns hold ReLU(bias) garbage; keep this slice


def _lpips_layer_kernel(fx_ref, fy_ref, w_ref, o_ref):
    # fx/fy: (C, Pt, HWpad) channel-major features; w: (C, 1, 1) lin weights / true_HW
    a = fx_ref[...].astype(jnp.float32)
    b = fy_ref[...].astype(jnp.float32)
    eps2 = 1e-20                                                # (lpips eps=1e-10)^2
    inv_a = lax.rsqrt(jnp.sum(a * a, axis=0, keepdims=True) + eps2)   # single EUP push
    inv_b = lax.rsqrt(jnp.sum(b * b, axis=0, keepdims=True) + eps2)
    d = (a * inv_a - b * inv_b) ** 2
    weighted = jnp.sum(d * w_ref[...], axis=0)                  # (Pt, HWpad)
    o_ref[...] = jnp.sum(weighted, axis=-1, keepdims=True)      # zero-padded lanes add 0


def lpips_layer_pallas(fx, fy, w_scaled):
    # fx, fy: (C, P pairs, HWpad); w_scaled: (C, 1, 1) -> per-pair layer distance (P, 1)
    C, P, HWp = fx.shape
    p_tile = 8 if P % 8 == 0 else P
    return pl.pallas_call(
        _lpips_layer_kernel,
        out_shape=jax.ShapeDtypeStruct((P, 1), jnp.float32),
        grid=(P // p_tile,),
        in_specs=[
            pl.BlockSpec((C, p_tile, HWp), lambda i: (0, i, 0)),
            pl.BlockSpec((C, p_tile, HWp), lambda i: (0, i, 0)),
            pl.BlockSpec((C, 1, 1), lambda i: (0, 0, 0)),
        ],
        out_specs=pl.BlockSpec((p_tile, 1), lambda i: (i, 0)),
        compiler_params=pltpu.CompilerParams(
            dimension_semantics=("parallel",),
            vmem_limit_bytes=VMEM_LIMIT),
    )(fx, fy, w_scaled)


# ----------------------------- glue (plain JAX) -------------------------------

def _make_dft_matrix():
    # Packed [cos ; -sin] DFT with the hann window and 1/sqrt(n_fft) norm folded in.
    n = np.arange(N_FFT, dtype=np.float64)
    window = 0.5 - 0.5 * np.cos(2.0 * np.pi * n / N_FFT)      # torch.hann_window (periodic)
    scale = 1.0 / np.sqrt(N_FFT)                              # torch.stft(normalized=True)
    k = np.arange(N_FREQ, dtype=np.float64)
    ang = 2.0 * np.pi * np.outer(k, n) / N_FFT                # (N_FREQ, N_FFT)
    dftw = np.zeros((2 * F_PAD, N_FFT), dtype=np.float64)
    dftw[:N_FREQ] = np.cos(ang) * window * scale
    dftw[F_PAD:F_PAD + N_FREQ] = -np.sin(ang) * window * scale
    return jnp.asarray(dftw, jnp.float32)


def conv3x3_relu_cm(x_cm, w, b):
    # Channel-major 3x3 same conv + bias + ReLU:  (Cin, N, H, W) -> (Cout, N, H, W).
    Cin, N, H, W = x_cm.shape
    Cout = w.shape[-1]
    xp = jnp.pad(x_cm, ((0, 0), (0, 0), (1, 1), (1, 1)))
    # TODO(synk): 9x im2col expansion stays in XLA (built channel-major so no transpose);
    # full halo-DMA in-kernel im2col is not implemented.
    cols = jnp.concatenate(
        [xp[:, :, dy:dy + H, dx:dx + W].reshape(Cin, N * H * W)
         for dy in range(3) for dx in range(3)], axis=0)       # (9*Cin, M) tap-major
    w_mat = jnp.transpose(w.reshape(9, Cin, Cout), (2, 0, 1)).reshape(Cout, 9 * Cin)
    y = conv_mm_pallas(w_mat, cols, b)                         # (Cout, M) bf16 lane-dense
    return y.reshape(Cout, N, H, W)


def avgpool2_cm(x):
    # TODO(synk): 2x2 avg-pool kept as a cheap XLA reshape/mean in channel-major layout.
    C, N, H, W = x.shape
    H2, W2 = H // 2, W // 2
    return x[:, :, :H2 * 2, :W2 * 2].reshape(C, N, H2, 2, W2, 2).mean(axis=(3, 5))


def vgg_features_cm(x_cm, params):
    # TODO(synk): pretrained lpips.LPIPS(net='vgg') backbone has no in-script equivalent;
    # deterministic 3-stage surrogate with identical per-layer math (conv3x3+ReLU+avgpool).
    feats = []
    h = x_cm
    for i in range(len(FEAT_CH)):
        h = conv3x3_relu_cm(h, params["w%d" % (i + 1)], params["b%d" % (i + 1)])
        feats.append(h)
        if i + 1 < len(FEAT_CH):
            h = avgpool2_cm(h)
    return feats


def perceptual_loss(inputs, target, params, dftw):
    # inputs/target: (B, S=4 sources, C=2 audio channels, T)
    B, S, Ca, T = inputs.shape
    # Pre-order audio rows as (Ca, half, S, B) so every later step is a pure reshape.
    x_all = jnp.stack([inputs, target], axis=0)                # (2, B, S, Ca, T)
    x_all = jnp.transpose(x_all, (3, 0, 2, 1, 4))              # (Ca, 2, S, B, T)
    R = Ca * 2 * S * B
    mag, n_frames = stft_mag_pallas(x_all.reshape(R, T), dftw)  # (R, F_PAD, FR_PAD)
    spec = mag[:, :N_FREQ, :n_frames]                          # (R, Fr, Fw)
    Fr, Fw = N_FREQ, n_frames
    spec = spec.reshape(Ca, 2 * S * B, Fr, Fw)                 # (Ca, Nimg, Fr, Fw)

    # 3-channel images [ch0, ch1, mean] with the LPIPS ScalingLayer fused into assembly
    # (scaling applied before conv zero-padding, matching lpips' op order exactly).
    sh, sc = LPIPS_SHIFT, LPIPS_SCALE
    imgs = jnp.stack([
        (spec[0] - float(sh[0])) / float(sc[0]),
        (spec[1] - float(sh[1])) / float(sc[1]),
        (0.5 * (spec[0] + spec[1]) - float(sh[2])) / float(sc[2]),
    ], axis=0)                                                 # (3, Nimg, Fr, Fw)

    feats = vgg_features_cm(imgs, params)                      # one conv chain for all imgs
    P = S * B                                                  # pairs, ordered (source, batch)
    # TODO(synk): the 3 LPIPS layer calls are not merged; per-layer C/HW differ and padding
    # to a common shape would add more HBM bytes than the two saved launches.
    total = jnp.zeros((P, 1), jnp.float32)
    for k, f in enumerate(feats):
        Ck, Nimg, H, W = f.shape
        HW = H * W
        HWp = _round_up(HW, 128)                               # lane-dense LPIPS blocks
        fm = jnp.pad(f.reshape(Ck, Nimg, HW), ((0, 0), (0, 0), (0, HWp - HW)))
        w_scaled = (params["lin%d" % (k + 1)] / HW).reshape(Ck, 1, 1).astype(jnp.float32)
        total = total + lpips_layer_pallas(fm[:, :P], fm[:, P:], w_scaled)
    per_source = total.reshape(S, B).sum(axis=1)               # sum over batch, per source
    return tuple(per_source[s] for s in range(S))              # (drums, bass, other, vocals)


def init_params(key):
    c_in = 3
    keys = jax.random.split(key, 2 * len(FEAT_CH))
    params = {}
    prev = c_in
    for i, c in enumerate(FEAT_CH):
        params["w%d" % (i + 1)] = 0.1 * jax.random.normal(keys[2 * i], (3, 3, prev, c), jnp.float32)
        params["b%d" % (i + 1)] = jnp.zeros((c,), jnp.float32)
        params["lin%d" % (i + 1)] = 0.1 * jnp.abs(
            jax.random.normal(keys[2 * i + 1], (c,), jnp.float32))
        prev = c
    return params


# ----------------------------------- main -------------------------------------

if __name__ == "__main__":
    key = jax.random.PRNGKey(0)
    k_in, k_tg, k_par = jax.random.split(key, 3)

    B, S, C, T = 2, 4, 2, 64          # batch, sources, audio channels, samples
    inputs = jax.random.normal(k_in, (B, S, C, T), jnp.float32)
    target = jax.random.normal(k_tg, (B, S, C, T), jnp.float32)

    params = init_params(k_par)
    dftw = _make_dft_matrix()

    loss_fn = jax.jit(perceptual_loss)
    drums, bass, other, vocals = loss_fn(inputs, target, params, dftw)
    jax.block_until_ready((drums, bass, other, vocals))

    for name, val in (("drums", drums), ("bass", bass), ("other", other), ("vocals", vocals)):
        assert jnp.isfinite(val), name
    print("KERNEL_OK")
</pallas_src>

<mosaic_0001>
module attributes {stable_mosaic.version = 11 : i64} {
  func.func @_stft_mag_kernel(%arg0: i32, %arg1: memref<48x32xf32, #tpu.memory_space<vmem>>, %arg2: memref<1x8x256xf32, #tpu.memory_space<vmem>>, %arg3: memref<1x24x128xf32, #tpu.memory_space<vmem>>) attributes {dimension_semantics = [#tpu.dimension_semantics<parallel>], iteration_bounds = array<i64: 32>, scalar_prefetch = 0 : i64, scratch_operands = 0 : i64, tpu.core_type = #tpu.core_type<tc>, window_params = [{pipeline_mode = #tpu.pipeline_mode<synchronous>, transform_indices = @transform_0, window_bounds = array<i64: 48, 32>}, {transform_indices = @transform_1, window_bounds = array<i64: 1, 8, 256>}, {transform_indices = @transform_2, window_bounds = array<i64: 1, 24, 128>}]} {
    %c0 = arith.constant 0 : index
    %c0_0 = arith.constant 0 : index
    %c0_1 = arith.constant 0 : index
    %0 = vector.load %arg2[%c0, %c0_0, %c0_1] : memref<1x8x256xf32, #tpu.memory_space<vmem>>, vector<1x8x128xf32>
    %1 = vector.shape_cast %0 : vector<1x8x128xf32> to vector<8x128xf32>
    %c0_2 = arith.constant 0 : index
    %c0_3 = arith.constant 0 : index
    %c1 = arith.constant 1 : index
    %2 = vector.load %arg2[%c0_2, %c0_3, %c1] : memref<1x8x256xf32, #tpu.memory_space<vmem>>, vector<1x8x128xf32>
    %3 = vector.shape_cast %2 : vector<1x8x128xf32> to vector<8x128xf32>
    %c0_4 = arith.constant 0 : index
    %c0_5 = arith.constant 0 : index
    %c2 = arith.constant 2 : index
    %4 = vector.load %arg2[%c0_4, %c0_5, %c2] : memref<1x8x256xf32, #tpu.memory_space<vmem>>, vector<1x8x128xf32>
    %5 = vector.shape_cast %4 : vector<1x8x128xf32> to vector<8x128xf32>
    %c0_6 = arith.constant 0 : index
    %c0_7 = arith.constant 0 : index
    %c3 = arith.constant 3 : index
    %6 = vector.load %arg2[%c0_6, %c0_7, %c3] : memref<1x8x256xf32, #tpu.memory_space<vmem>>, vector<1x8x128xf32>
    %7 = vector.shape_cast %6 : vector<1x8x128xf32> to vector<8x128xf32>
    %8 = tpu.concatenate %1, %3, %5, %7 in 0 : vector<8x128xf32>, vector<8x128xf32>, vector<8x128xf32>, vector<8x128xf32> -> vector<32x128xf32>
    %c0_8 = arith.constant 0 : index
    %c0_9 = arith.constant 0 : index
    %9 = vector.load %arg1[%c0_8, %c0_9] : memref<48x32xf32, #tpu.memory_space<vmem>>, vector<48x32xf32>
    %cst = arith.constant dense<0.000000e+00> : vector<48x128xf32>
    %10 = tpu.matmul %9, %8, %cst {dimension_numbers = #tpu.dot_dimension_numbers<[1], [0], [0], [1], [0, 0, 1, 1], [], []>} : vector<48x32xf32>, vector<32x128xf32>, vector<48x128xf32> -> vector<48x128xf32>
    %11 = vector.extract_strided_slice %10 {offsets = [0, 0], sizes = [24, 128], strides = [1, 1]} : vector<48x128xf32> to vector<24x128xf32>
    %12 = vector.extract_strided_slice %10 {offsets = [24, 0], sizes = [24, 128], strides = [1, 1]} : vector<48x128xf32> to vector<24x128xf32>
    %13 = arith.mulf %11, %11 : vector<24x128xf32>
    %14 = arith.mulf %12, %12 : vector<24x128xf32>
    %15 = arith.addf %13, %14 : vector<24x128xf32>
    %16 = math.sqrt %15 : vector<24x128xf32>
    %c0_10 = arith.constant 0 : index
    %c0_11 = arith.constant 0 : index
    %c0_12 = arith.constant 0 : index
    %17 = vector.load %arg3[%c0_10, %c0_11, %c0_12] : memref<1x24x128xf32, #tpu.memory_space<vmem>>, vector<1x24x128xf32>
    %18 = vector.shape_cast %17 : vector<1x24x128xf32> to vector<24x128xf32>
    %19 = vector.shape_cast %16 : vector<24x128xf32> to vector<1x24x128xf32>
    tpu.vector_store %arg3[%c0_10, %c0_11, %c0_12], %19 {strides = array<i32>} : memref<1x24x128xf32, #tpu.memory_space<vmem>>, vector<1x24x128xf32>,
    return
  }
  func.func @transform_0(%arg0: i32) -> (i32, i32) {
    %c0_i32 = arith.constant 0 : i32
    %c0_i32_0 = arith.constant 0 : i32
    %c0_i32_1 = arith.constant 0 : i32
    return %c0_i32, %c0_i32_0 : i32, i32
  }
  func.func @transform_1(%arg0: i32) -> (i32, i32, i32) {
    %c0_i32 = arith.constant 0 : i32
    %c0_i32_0 = arith.constant 0 : i32
    %c0_i32_1 = arith.constant 0 : i32
    return %arg0, %c0_i32, %c0_i32_0 : i32, i32, i32
  }
  func.func @transform_2(%arg0: i32) -> (i32, i32, i32) {
    %c0_i32 = arith.constant 0 : i32
    %c0_i32_0 = arith.constant 0 : i32
    %c0_i32_1 = arith.constant 0 : i32
    return %arg0, %c0_i32, %c0_i32_0 : i32, i32, i32
  }
}

module attributes {stable_mosaic.version = 11 : i64} {
  func.func @_conv_mm_kernel(%arg0: i32, %arg1: memref<8x27xbf16, #tpu.memory_space<vmem>>, %arg2: memref<27x1024xbf16, #tpu.memory_space<vmem>>, %arg3: memref<8x1xf32, #tpu.memory_space<vmem>>, %arg4: memref<8x1024xbf16, #tpu.memory_space<vmem>>) attributes {dimension_semantics = [#tpu.dimension_semantics<parallel>], iteration_bounds = array<i64: 3>, scalar_prefetch = 0 : i64, scratch_operands = 0 : i64, tpu.core_type = #tpu.core_type<tc>, window_params = [{pipeline_mode = #tpu.pipeline_mode<synchronous>, transform_indices = @transform_0, window_bounds = array<i64: 8, 27>}, {transform_indices = @transform_1, window_bounds = array<i64: 27, 1024>}, {pipeline_mode = #tpu.pipeline_mode<synchronous>, transform_indices = @transform_2, window_bounds = array<i64: 8, 1>}, {transform_indices = @transform_3, window_bounds = array<i64: 8, 1024>}]} {
    %c0 = arith.constant 0 : index
    %c0_0 = arith.constant 0 : index
    %0 = vector.load %arg1[%c0, %c0_0] : memref<8x27xbf16, #tpu.memory_space<vmem>>, vector<8x27xbf16>
    %c0_1 = arith.constant 0 : index
    %c0_2 = arith.constant 0 : index
    %1 = vector.load %arg2[%c0_1, %c0_2] : memref<27x1024xbf16, #tpu.memory_space<vmem>>, vector<27x1024xbf16>
    %cst = arith.constant dense<0.000000e+00> : vector<8x1024xf32>
    %2 = tpu.matmul %0, %1, %cst {dimension_numbers = #tpu.dot_dimension_numbers<[1], [0], [0], [1], [0, 0, 1, 1], [], []>} : vector<8x27xbf16>, vector<27x1024xbf16>, vector<8x1024xf32> -> vector<8x1024xf32>
    %c0_3 = arith.constant 0 : index
    %c0_4 = arith.constant 0 : index
    %3 = vector.load %arg3[%c0_3, %c0_4] : memref<8x1xf32, #tpu.memory_space<vmem>>, vector<8x1xf32>
    %4 = vector.broadcast %3 : vector<8x1xf32> to vector<8x1024xf32>
    %5 = arith.addf %2, %4 : vector<8x1024xf32>
    %cst_5 = arith.constant 0.000000e+00 : f32
    %6 = vector.broadcast %cst_5 : f32 to vector<8x1024xf32>
    %7 = arith.maximumf %5, %6 : vector<8x1024xf32>
    %8 = arith.truncf %7 : vector<8x1024xf32> to vector<8x1024xbf16>
    %c0_6 = arith.constant 0 : index
    %c0_7 = arith.constant 0 : index
    %9 = vector.load %arg4[%c0_6, %c0_7] : memref<8x1024xbf16, #tpu.memory_space<vmem>>, vector<8x1024xbf16>
    tpu.vector_store %arg4[%c0_6, %c0_7], %8 {strides = array<i32>} : memref<8x1024xbf16, #tpu.memory_space<vmem>>, vector<8x1024xbf16>,
    return
  }
  func.func @transform_0(%arg0: i32) -> (i32, i32) {
    %c0_i32 = arith.constant 0 : i32
    %c0_i32_0 = arith.constant 0 : i32
    %c0_i32_1 = arith.constant 0 : i32
    return %c0_i32, %c0_i32_0 : i32, i32
  }
  func.func @transform_1(%arg0: i32) -> (i32, i32) {
    %c0_i32 = arith.constant 0 : i32
    %c0_i32_0 = arith.constant 0 : i32
    return %c0_i32, %arg0 : i32, i32
  }
  func.func @transform_2(%arg0: i32) -> (i32, i32) {
    %c0_i32 = arith.constant 0 : i32
    %c0_i32_0 = arith.constant 0 : i32
    %c0_i32_1 = arith.constant 0 : i32
    return %c0_i32, %c0_i32_0 : i32, i32
  }
  func.func @transform_3(%arg0: i32) -> (i32, i32) {
    %c0_i32 = arith.constant 0 : i32
    %c0_i32_0 = arith.constant 0 : i32
    return %c0_i32, %arg0 : i32, i32
  }
}

module attributes {stable_mosaic.version = 11 : i64} {
  func.func @_lpips_layer_kernel(%arg0: i32, %arg1: memref<8x8x256xbf16, #tpu.memory_space<vmem>>, %arg2: memref<8x8x256xbf16, #tpu.memory_space<vmem>>, %arg3: memref<8x1x1xf32, #tpu.memory_space<vmem>>, %arg4: memref<8x1xf32, #tpu.memory_space<vmem>>) attributes {dimension_semantics = [#tpu.dimension_semantics<parallel>], iteration_bounds = array<i64: 1>, scalar_prefetch = 0 : i64, scratch_operands = 0 : i64, tpu.core_type = #tpu.core_type<tc>, window_params = [{transform_indices = @transform_0, window_bounds = array<i64: 8, 8, 256>}, {transform_indices = @transform_1, window_bounds = array<i64: 8, 8, 256>}, {pipeline_mode = #tpu.pipeline_mode<synchronous>, transform_indices = @transform_2, window_bounds = array<i64: 8, 1, 1>}, {transform_indices = @transform_3, window_bounds = array<i64: 8, 1>}]} {
    %c0 = arith.constant 0 : index
    %c0_0 = arith.constant 0 : index
    %c0_1 = arith.constant 0 : index
    %0 = vector.load %arg1[%c0, %c0_0, %c0_1] : memref<8x8x256xbf16, #tpu.memory_space<vmem>>, vector<8x8x256xbf16>
    %1 = arith.extf %0 : vector<8x8x256xbf16> to vector<8x8x256xf32>
    %c0_2 = arith.constant 0 : index
    %c0_3 = arith.constant 0 : index
    %c0_4 = arith.constant 0 : index
    %2 = vector.load %arg2[%c0_2, %c0_3, %c0_4] : memref<8x8x256xbf16, #tpu.memory_space<vmem>>, vector<8x8x256xbf16>
    %3 = arith.extf %2 : vector<8x8x256xbf16> to vector<8x8x256xf32>
    %4 = arith.mulf %1, %1 : vector<8x8x256xf32>
    %cst = arith.constant dense<0.000000e+00> : vector<8x256xf32>
    %5 = vector.multi_reduction <add>, %4, %cst [0] : vector<8x8x256xf32> to vector<8x256xf32>
    %6 = vector.shape_cast %5 : vector<8x256xf32> to vector<1x8x256xf32>
    %cst_5 = arith.constant 9.99999968E-21 : f32
    %7 = vector.broadcast %cst_5 : f32 to vector<1x8x256xf32>
    %8 = arith.addf %6, %7 : vector<1x8x256xf32>
    %9 = math.rsqrt %8 : vector<1x8x256xf32>
    %10 = arith.mulf %3, %3 : vector<8x8x256xf32>
    %cst_6 = arith.constant dense<0.000000e+00> : vector<8x256xf32>
    %11 = vector.multi_reduction <add>, %10, %cst_6 [0] : vector<8x8x256xf32> to vector<8x256xf32>
    %12 = vector.shape_cast %11 : vector<8x256xf32> to vector<1x8x256xf32>
    %cst_7 = arith.constant 9.99999968E-21 : f32
    %13 = vector.broadcast %cst_7 : f32 to vector<1x8x256xf32>
    %14 = arith.addf %12, %13 : vector<1x8x256xf32>
    %15 = math.rsqrt %14 : vector<1x8x256xf32>
    %16 = vector.broadcast %9 : vector<1x8x256xf32> to vector<8x8x256xf32>
    %17 = arith.mulf %1, %16 : vector<8x8x256xf32>
    %18 = vector.broadcast %15 : vector<1x8x256xf32> to vector<8x8x256xf32>
    %19 = arith.mulf %3, %18 : vector<8x8x256xf32>
    %20 = arith.subf %17, %19 : vector<8x8x256xf32>
    %21 = arith.mulf %20, %20 : vector<8x8x256xf32>
    %c0_8 = arith.constant 0 : index
    %c0_9 = arith.constant 0 : index
    %c0_10 = arith.constant 0 : index
    %22 = vector.load %arg3[%c0_8, %c0_9, %c0_10] : memref<8x1x1xf32, #tpu.memory_space<vmem>>, vector<8x1x1xf32>
    %23 = vector.broadcast %22 : vector<8x1x1xf32> to vector<8x8x256xf32>
    %24 = arith.mulf %21, %23 : vector<8x8x256xf32>
    %cst_11 = arith.constant dense<0.000000e+00> : vector<8x256xf32>
    %25 = vector.multi_reduction <add>, %24, %cst_11 [0] : vector<8x8x256xf32> to vector<8x256xf32>
    %cst_12 = arith.constant dense<0.000000e+00> : vector<8xf32>
    %26 = vector.multi_reduction <add>, %25, %cst_12 [1] : vector<8x256xf32> to vector<8xf32>
    %27 = vector.shape_cast %26 : vector<8xf32> to vector<8x1xf32>
    %c0_13 = arith.constant 0 : index
    %c0_14 = arith.constant 0 : index
    %28 = vector.load %arg4[%c0_13, %c0_14] : memref<8x1xf32, #tpu.memory_space<vmem>>, vector<8x1xf32>
    tpu.vector_store %arg4[%c0_13, %c0_14], %27 {strides = array<i32>} : memref<8x1xf32, #tpu.memory_space<vmem>>, vector<8x1xf32>,
    return
  }
  func.func @transform_0(%arg0: i32) -> (i32, i32, i32) {
    %c0_i32 = arith.constant 0 : i32
    %c0_i32_0 = arith.constant 0 : i32
    %c0_i32_1 = arith.constant 0 : i32
    return %c0_i32, %arg0, %c0_i32_0 : i32, i32, i32
  }
  func.func @transform_1(%arg0: i32) -> (i32, i32, i32) {
    %c0_i32 = arith.constant 0 : i32
    %c0_i32_0 = arith.constant 0 : i32
    %c0_i32_1 = arith.constant 0 : i32
    return %c0_i32, %arg0, %c0_i32_0 : i32, i32, i32
  }
  func.func @transform_2(%arg0: i32) -> (i32, i32, i32) {
    %c0_i32 = arith.constant 0 : i32
    %c0_i32_0 = arith.constant 0 : i32
    %c0_i32_1 = arith.constant 0 : i32
    %c0_i32_2 = arith.constant 0 : i32
    return %c0_i32, %c0_i32_0, %c0_i32_1 : i32, i32, i32
  }
  func.func @transform_3(%arg0: i32) -> (i32, i32) {
    %c0_i32 = arith.constant 0 : i32
    %c0_i32_0 = arith.constant 0 : i32
    return %arg0, %c0_i32 : i32, i32
  }
}

module attributes {stable_mosaic.version = 11 : i64} {
  func.func @_conv_mm_kernel(%arg0: i32, %arg1: memref<16x72xbf16, #tpu.memory_space<vmem>>, %arg2: memref<72x256xbf16, #tpu.memory_space<vmem>>, %arg3: memref<16x1xf32, #tpu.memory_space<vmem>>, %arg4: memref<16x256xbf16, #tpu.memory_space<vmem>>) attributes {dimension_semantics = [#tpu.dimension_semantics<parallel>], iteration_bounds = array<i64: 2>, scalar_prefetch = 0 : i64, scratch_operands = 0 : i64, tpu.core_type = #tpu.core_type<tc>, window_params = [{pipeline_mode = #tpu.pipeline_mode<synchronous>, transform_indices = @transform_0, window_bounds = array<i64: 16, 72>}, {transform_indices = @transform_1, window_bounds = array<i64: 72, 256>}, {pipeline_mode = #tpu.pipeline_mode<synchronous>, transform_indices = @transform_2, window_bounds = array<i64: 16, 1>}, {transform_indices = @transform_3, window_bounds = array<i64: 16, 256>}]} {
    %c0 = arith.constant 0 : index
    %c0_0 = arith.constant 0 : index
    %0 = vector.load %arg1[%c0, %c0_0] : memref<16x72xbf16, #tpu.memory_space<vmem>>, vector<16x72xbf16>
    %c0_1 = arith.constant 0 : index
    %c0_2 = arith.constant 0 : index
    %1 = vector.load %arg2[%c0_1, %c0_2] : memref<72x256xbf16, #tpu.memory_space<vmem>>, vector<72x256xbf16>
    %cst = arith.constant dense<0.000000e+00> : vector<16x256xf32>
    %2 = tpu.matmul %0, %1, %cst {dimension_numbers = #tpu.dot_dimension_numbers<[1], [0], [0], [1], [0, 0, 1, 1], [], []>} : vector<16x72xbf16>, vector<72x256xbf16>, vector<16x256xf32> -> vector<16x256xf32>
    %c0_3 = arith.constant 0 : index
    %c0_4 = arith.constant 0 : index
    %3 = vector.load %arg3[%c0_3, %c0_4] : memref<16x1xf32, #tpu.memory_space<vmem>>, vector<16x1xf32>
    %4 = vector.broadcast %3 : vector<16x1xf32> to vector<16x256xf32>
    %5 = arith.addf %2, %4 : vector<16x256xf32>
    %cst_5 = arith.constant 0.000000e+00 : f32
    %6 = vector.broadcast %cst_5 : f32 to vector<16x256xf32>
    %7 = arith.maximumf %5, %6 : vector<16x256xf32>
    %8 = arith.truncf %7 : vector<16x256xf32> to vector<16x256xbf16>
    %c0_6 = arith.constant 0 : index
    %c0_7 = arith.constant 0 : index
    %9 = vector.load %arg4[%c0_6, %c0_7] : memref<16x256xbf16, #tpu.memory_space<vmem>>, vector<16x256xbf16>
    tpu.vector_store %arg4[%c0_6, %c0_7], %8 {strides = array<i32>} : memref<16x256xbf16, #tpu.memory_space<vmem>>, vector<16x256xbf16>,
    return
  }
  func.func @transform_0(%arg0: i32) -> (i32, i32) {
    %c0_i32 = arith.constant 0 : i32
    %c0_i32_0 = arith.constant 0 : i32
    %c0_i32_1 = arith.constant 0 : i32
    return %c0_i32, %c0_i32_0 : i32, i32
  }
  func.func @transform_1(%arg0: i32) -> (i32, i32) {
    %c0_i32 = arith.constant 0 : i32
    %c0_i32_0 = arith.constant 0 : i32
    return %c0_i32, %arg0 : i32, i32
  }
  func.func @transform_2(%arg0: i32) -> (i32, i32) {
    %c0_i32 = arith.constant 0 : i32
    %c0_i32_0 = arith.constant 0 : i32
    %c0_i32_1 = arith.constant 0 : i32
    return %c0_i32, %c0_i32_0 : i32, i32
  }
  func.func @transform_3(%arg0: i32) -> (i32, i32) {
    %c0_i32 = arith.constant 0 : i32
    %c0_i32_0 = arith.constant 0 : i32
    return %c0_i32, %arg0 : i32, i32
  }
}

module attributes {stable_mosaic.version = 11 : i64} {
  func.func @_lpips_layer_kernel(%arg0: i32, %arg1: memref<16x8x128xbf16, #tpu.memory_space<vmem>>, %arg2: memref<16x8x128xbf16, #tpu.memory_space<vmem>>, %arg3: memref<16x1x1xf32, #tpu.memory_space<vmem>>, %arg4: memref<8x1xf32, #tpu.memory_space<vmem>>) attributes {dimension_semantics = [#tpu.dimension_semantics<parallel>], iteration_bounds = array<i64: 1>, scalar_prefetch = 0 : i64, scratch_operands = 0 : i64, tpu.core_type = #tpu.core_type<tc>, window_params = [{transform_indices = @transform_0, window_bounds = array<i64: 16, 8, 128>}, {transform_indices = @transform_1, window_bounds = array<i64: 16, 8, 128>}, {pipeline_mode = #tpu.pipeline_mode<synchronous>, transform_indices = @transform_2, window_bounds = array<i64: 16, 1, 1>}, {transform_indices = @transform_3, window_bounds = array<i64: 8, 1>}]} {
    %c0 = arith.constant 0 : index
    %c0_0 = arith.constant 0 : index
    %c0_1 = arith.constant 0 : index
    %0 = vector.load %arg1[%c0, %c0_0, %c0_1] : memref<16x8x128xbf16, #tpu.memory_space<vmem>>, vector<16x8x128xbf16>
    %1 = arith.extf %0 : vector<16x8x128xbf16> to vector<16x8x128xf32>
    %c0_2 = arith.constant 0 : index
    %c0_3 = arith.constant 0 : index
    %c0_4 = arith.constant 0 : index
    %2 = vector.load %arg2[%c0_2, %c0_3, %c0_4] : memref<16x8x128xbf16, #tpu.memory_space<vmem>>, vector<16x8x128xbf16>
    %3 = arith.extf %2 : vector<16x8x128xbf16> to vector<16x8x128xf32>
    %4 = arith.mulf %1, %1 : vector<16x8x128xf32>
    %cst = arith.constant dense<0.000000e+00> : vector<8x128xf32>
    %5 = vector.multi_reduction <add>, %4, %cst [0] : vector<16x8x128xf32> to vector<8x128xf32>
    %6 = vector.shape_cast %5 : vector<8x128xf32> to vector<1x8x128xf32>
    %cst_5 = arith.constant 9.99999968E-21 : f32
    %7 = vector.broadcast %cst_5 : f32 to vector<1x8x128xf32>
    %8 = arith.addf %6, %7 : vector<1x8x128xf32>
    %9 = math.rsqrt %8 : vector<1x8x128xf32>
    %10 = arith.mulf %3, %3 : vector<16x8x128xf32>
    %cst_6 = arith.constant dense<0.000000e+00> : vector<8x128xf32>
    %11 = vector.multi_reduction <add>, %10, %cst_6 [0] : vector<16x8x128xf32> to vector<8x128xf32>
    %12 = vector.shape_cast %11 : vector<8x128xf32> to vector<1x8x128xf32>
    %cst_7 = arith.constant 9.99999968E-21 : f32
    %13 = vector.broadcast %cst_7 : f32 to vector<1x8x128xf32>
    %14 = arith.addf %12, %13 : vector<1x8x128xf32>
    %15 = math.rsqrt %14 : vector<1x8x128xf32>
    %16 = vector.broadcast %9 : vector<1x8x128xf32> to vector<16x8x128xf32>
    %17 = arith.mulf %1, %16 : vector<16x8x128xf32>
    %18 = vector.broadcast %15 : vector<1x8x128xf32> to vector<16x8x128xf32>
    %19 = arith.mulf %3, %18 : vector<16x8x128xf32>
    %20 = arith.subf %17, %19 : vector<16x8x128xf32>
    %21 = arith.mulf %20, %20 : vector<16x8x128xf32>
    %c0_8 = arith.constant 0 : index
    %c0_9 = arith.constant 0 : index
    %c0_10 = arith.constant 0 : index
    %22 = vector.load %arg3[%c0_8, %c0_9, %c0_10] : memref<16x1x1xf32, #tpu.memory_space<vmem>>, vector<16x1x1xf32>
    %23 = vector.broadcast %22 : vector<16x1x1xf32> to vector<16x8x128xf32>
    %24 = arith.mulf %21, %23 : vector<16x8x128xf32>
    %cst_11 = arith.constant dense<0.000000e+00> : vector<8x128xf32>
    %25 = vector.multi_reduction <add>, %24, %cst_11 [0] : vector<16x8x128xf32> to vector<8x128xf32>
    %cst_12 = arith.constant dense<0.000000e+00> : vector<8xf32>
    %26 = vector.multi_reduction <add>, %25, %cst_12 [1] : vector<8x128xf32> to vector<8xf32>
    %27 = vector.shape_cast %26 : vector<8xf32> to vector<8x1xf32>
    %c0_13 = arith.constant 0 : index
    %c0_14 = arith.constant 0 : index
    %28 = vector.load %arg4[%c0_13, %c0_14] : memref<8x1xf32, #tpu.memory_space<vmem>>, vector<8x1xf32>
    tpu.vector_store %arg4[%c0_13, %c0_14], %27 {strides = array<i32>} : memref<8x1xf32, #tpu.memory_space<vmem>>, vector<8x1xf32>,
    return
  }
  func.func @transform_0(%arg0: i32) -> (i32, i32, i32) {
    %c0_i32 = arith.constant 0 : i32
    %c0_i32_0 = arith.constant 0 : i32
    %c0_i32_1 = arith.constant 0 : i32
    return %c0_i32, %arg0, %c0_i32_0 : i32, i32, i32
  }
  func.func @transform_1(%arg0: i32) -> (i32, i32, i32) {
    %c0_i32 = arith.constant 0 : i32
    %c0_i32_0 = arith.constant 0 : i32
    %c0_i32_1 = arith.constant 0 : i32
    return %c0_i32, %arg0, %c0_i32_0 : i32, i32, i32
  }
  func.func @transform_2(%arg0: i32) -> (i32, i32, i32) {
    %c0_i32 = arith.constant 0 : i32
    %c0_i32_0 = arith.constant 0 : i32
    %c0_i32_1 = arith.constant 0 : i32
    %c0_i32_2 = arith.constant 0 : i32
    return %c0_i32, %c0_i32_0, %c0_i32_1 : i32, i32, i32
  }
  func.func @transform_3(%arg0: i32) -> (i32, i32) {
    %c0_i32 = arith.constant 0 : i32
    %c0_i32_0 = arith.constant 0 : i32
    return %arg0, %c0_i32 : i32, i32
  }
}

module attributes {stable_mosaic.version = 11 : i64} {
  func.func @_conv_mm_kernel(%arg0: i32, %arg1: memref<32x144xbf16, #tpu.memory_space<vmem>>, %arg2: memref<144x128xbf16, #tpu.memory_space<vmem>>, %arg3: memref<32x1xf32, #tpu.memory_space<vmem>>, %arg4: memref<32x128xbf16, #tpu.memory_space<vmem>>) attributes {dimension_semantics = [#tpu.dimension_semantics<parallel>], iteration_bounds = array<i64: 1>, scalar_prefetch = 0 : i64, scratch_operands = 0 : i64, tpu.core_type = #tpu.core_type<tc>, window_params = [{pipeline_mode = #tpu.pipeline_mode<synchronous>, transform_indices = @transform_0, window_bounds = array<i64: 32, 144>}, {transform_indices = @transform_1, window_bounds = array<i64: 144, 128>}, {pipeline_mode = #tpu.pipeline_mode<synchronous>, transform_indices = @transform_2, window_bounds = array<i64: 32, 1>}, {transform_indices = @transform_3, window_bounds = array<i64: 32, 128>}]} {
    %c0 = arith.constant 0 : index
    %c0_0 = arith.constant 0 : index
    %0 = vector.load %arg1[%c0, %c0_0] : memref<32x144xbf16, #tpu.memory_space<vmem>>, vector<32x144xbf16>
    %c0_1 = arith.constant 0 : index
    %c0_2 = arith.constant 0 : index
    %1 = vector.load %arg2[%c0_1, %c0_2] : memref<144x128xbf16, #tpu.memory_space<vmem>>, vector<144x128xbf16>
    %cst = arith.constant dense<0.000000e+00> : vector<32x128xf32>
    %2 = tpu.matmul %0, %1, %cst {dimension_numbers = #tpu.dot_dimension_numbers<[1], [0], [0], [1], [0, 0, 1, 1], [], []>} : vector<32x144xbf16>, vector<144x128xbf16>, vector<32x128xf32> -> vector<32x128xf32>
    %c0_3 = arith.constant 0 : index
    %c0_4 = arith.constant 0 : index
    %3 = vector.load %arg3[%c0_3, %c0_4] : memref<32x1xf32, #tpu.memory_space<vmem>>, vector<32x1xf32>
    %4 = vector.broadcast %3 : vector<32x1xf32> to vector<32x128xf32>
    %5 = arith.addf %2, %4 : vector<32x128xf32>
    %cst_5 = arith.constant 0.000000e+00 : f32
    %6 = vector.broadcast %cst_5 : f32 to vector<32x128xf32>
    %7 = arith.maximumf %5, %6 : vector<32x128xf32>
    %8 = arith.truncf %7 : vector<32x128xf32> to vector<32x128xbf16>
    %c0_6 = arith.constant 0 : index
    %c0_7 = arith.constant 0 : index
    %9 = vector.load %arg4[%c0_6, %c0_7] : memref<32x128xbf16, #tpu.memory_space<vmem>>, vector<32x128xbf16>
    tpu.vector_store %arg4[%c0_6, %c0_7], %8 {strides = array<i32>} : memref<32x128xbf16, #tpu.memory_space<vmem>>, vector<32x128xbf16>,
    return
  }
  func.func @transform_0(%arg0: i32) -> (i32, i32) {
    %c0_i32 = arith.constant 0 : i32
    %c0_i32_0 = arith.constant 0 : i32
    %c0_i32_1 = arith.constant 0 : i32
    return %c0_i32, %c0_i32_0 : i32, i32
  }
  func.func @transform_1(%arg0: i32) -> (i32, i32) {
    %c0_i32 = arith.constant 0 : i32
    %c0_i32_0 = arith.constant 0 : i32
    return %c0_i32, %arg0 : i32, i32
  }
  func.func @transform_2(%arg0: i32) -> (i32, i32) {
    %c0_i32 = arith.constant 0 : i32
    %c0_i32_0 = arith.constant 0 : i32
    %c0_i32_1 = arith.constant 0 : i32
    return %c0_i32, %c0_i32_0 : i32, i32
  }
  func.func @transform_3(%arg0: i32) -> (i32, i32) {
    %c0_i32 = arith.constant 0 : i32
    %c0_i32_0 = arith.constant 0 : i32
    return %c0_i32, %arg0 : i32, i32
  }
}

module attributes {stable_mosaic.version = 11 : i64} {
  func.func @_lpips_layer_kernel(%arg0: i32, %arg1: memref<32x8x128xbf16, #tpu.memory_space<vmem>>, %arg2: memref<32x8x128xbf16, #tpu.memory_space<vmem>>, %arg3: memref<32x1x1xf32, #tpu.memory_space<vmem>>, %arg4: memref<8x1xf32, #tpu.memory_space<vmem>>) attributes {dimension_semantics = [#tpu.dimension_semantics<parallel>], iteration_bounds = array<i64: 1>, scalar_prefetch = 0 : i64, scratch_operands = 0 : i64, tpu.core_type = #tpu.core_type<tc>, window_params = [{transform_indices = @transform_0, window_bounds = array<i64: 32, 8, 128>}, {transform_indices = @transform_1, window_bounds = array<i64: 32, 8, 128>}, {pipeline_mode = #tpu.pipeline_mode<synchronous>, transform_indices = @transform_2, window_bounds = array<i64: 32, 1, 1>}, {transform_indices = @transform_3, window_bounds = array<i64: 8, 1>}]} {
    %c0 = arith.constant 0 : index
    %c0_0 = arith.constant 0 : index
    %c0_1 = arith.constant 0 : index
    %0 = vector.load %arg1[%c0, %c0_0, %c0_1] : memref<32x8x128xbf16, #tpu.memory_space<vmem>>, vector<32x8x128xbf16>
    %1 = arith.extf %0 : vector<32x8x128xbf16> to vector<32x8x128xf32>
    %c0_2 = arith.constant 0 : index
    %c0_3 = arith.constant 0 : index
    %c0_4 = arith.constant 0 : index
    %2 = vector.load %arg2[%c0_2, %c0_3, %c0_4] : memref<32x8x128xbf16, #tpu.memory_space<vmem>>, vector<32x8x128xbf16>
    %3 = arith.extf %2 : vector<32x8x128xbf16> to vector<32x8x128xf32>
    %4 = arith.mulf %1, %1 : vector<32x8x128xf32>
    %cst = arith.constant dense<0.000000e+00> : vector<8x128xf32>
    %5 = vector.multi_reduction <add>, %4, %cst [0] : vector<32x8x128xf32> to vector<8x128xf32>
    %6 = vector.shape_cast %5 : vector<8x128xf32> to vector<1x8x128xf32>
    %cst_5 = arith.constant 9.99999968E-21 : f32
    %7 = vector.broadcast %cst_5 : f32 to vector<1x8x128xf32>
    %8 = arith.addf %6, %7 : vector<1x8x128xf32>
    %9 = math.rsqrt %8 : vector<1x8x128xf32>
    %10 = arith.mulf %3, %3 : vector<32x8x128xf32>
    %cst_6 = arith.constant dense<0.000000e+00> : vector<8x128xf32>
    %11 = vector.multi_reduction <add>, %10, %cst_6 [0] : vector<32x8x128xf32> to vector<8x128xf32>
    %12 = vector.shape_cast %11 : vector<8x128xf32> to vector<1x8x128xf32>
    %cst_7 = arith.constant 9.99999968E-21 : f32
    %13 = vector.broadcast %cst_7 : f32 to vector<1x8x128xf32>
    %14 = arith.addf %12, %13 : vector<1x8x128xf32>
    %15 = math.rsqrt %14 : vector<1x8x128xf32>
    %16 = vector.broadcast %9 : vector<1x8x128xf32> to vector<32x8x128xf32>
    %17 = arith.mulf %1, %16 : vector<32x8x128xf32>
    %18 = vector.broadcast %15 : vector<1x8x128xf32> to vector<32x8x128xf32>
    %19 = arith.mulf %3, %18 : vector<32x8x128xf32>
    %20 = arith.subf %17, %19 : vector<32x8x128xf32>
    %21 = arith.mulf %20, %20 : vector<32x8x128xf32>
    %c0_8 = arith.constant 0 : index
    %c0_9 = arith.constant 0 : index
    %c0_10 = arith.constant 0 : index
    %22 = vector.load %arg3[%c0_8, %c0_9, %c0_10] : memref<32x1x1xf32, #tpu.memory_space<vmem>>, vector<32x1x1xf32>
    %23 = vector.broadcast %22 : vector<32x1x1xf32> to vector<32x8x128xf32>
    %24 = arith.mulf %21, %23 : vector<32x8x128xf32>
    %cst_11 = arith.constant dense<0.000000e+00> : vector<8x128xf32>
    %25 = vector.multi_reduction <add>, %24, %cst_11 [0] : vector<32x8x128xf32> to vector<8x128xf32>
    %cst_12 = arith.constant dense<0.000000e+00> : vector<8xf32>
    %26 = vector.multi_reduction <add>, %25, %cst_12 [1] : vector<8x128xf32> to vector<8xf32>
    %27 = vector.shape_cast %26 : vector<8xf32> to vector<8x1xf32>
    %c0_13 = arith.constant 0 : index
    %c0_14 = arith.constant 0 : index
    %28 = vector.load %arg4[%c0_13, %c0_14] : memref<8x1xf32, #tpu.memory_space<vmem>>, vector<8x1xf32>
    tpu.vector_store %arg4[%c0_13, %c0_14], %27 {strides = array<i32>} : memref<8x1xf32, #tpu.memory_space<vmem>>, vector<8x1xf32>,
    return
  }
  func.func @transform_0(%arg0: i32) -> (i32, i32, i32) {
    %c0_i32 = arith.constant 0 : i32
    %c0_i32_0 = arith.constant 0 : i32
    %c0_i32_1 = arith.constant 0 : i32
    return %c0_i32, %arg0, %c0_i32_0 : i32, i32, i32
  }
  func.func @transform_1(%arg0: i32) -> (i32, i32, i32) {
    %c0_i32 = arith.constant 0 : i32
    %c0_i32_0 = arith.constant 0 : i32
    %c0_i32_1 = arith.constant 0 : i32
    return %c0_i32, %arg0, %c0_i32_0 : i32, i32, i32
  }
  func.func @transform_2(%arg0: i32) -> (i32, i32, i32) {
    %c0_i32 = arith.constant 0 : i32
    %c0_i32_0 = arith.constant 0 : i32
    %c0_i32_1 = arith.constant 0 : i32
    %c0_i32_2 = arith.constant 0 : i32
    return %c0_i32, %c0_i32_0, %c0_i32_1 : i32, i32, i32
  }
  func.func @transform_3(%arg0: i32) -> (i32, i32) {
    %c0_i32 = arith.constant 0 : i32
    %c0_i32_0 = arith.constant 0 : i32
    return %arg0, %c0_i32 : i32, i32
  }
}

</mosaic_0001>

<bundles_post_ra>
// kernel: perceptual_loss.7
= control target key start
LH: loop header
LB: loop body
LE: loop exit
PB: predicated region body
PF: predicated region fallthrough
CT: control target
= control target key end

     0   :  { %s493_s9 = smov 0   ;;  %s538_s0 = inlined_call_operand.vmem [shape: f32[48,32], index: 0, kind: input, shape index: {}]   ;;  %s539_s1 = inlined_call_operand.vmem [shape: f32[32,8,256], index: 1, kind: input, shape index: {}]   ;;  %s540_s2 = inlined_call_operand.vmem [shape: f32[32,24,128], index: 2, kind: output, shape index: {}]  }
   0x1 LB: > { %s378_s10 = sadd.s32 4294967295, %s473_s9   ;;  %p382_p0 = scmp.ge.s32.totalorder %s473_s9, 1  ;;  %s473_s9 = sphi %s493_s9, %s12_s9  }
   0x2   : > { %p112_p1 = scmp.lt.s32.totalorder %s473_s9, 33 }
   0x4   : > { %p113_p2 = pnand %p382_p0, %p112_p1 }
   0x5   : > { %p134_p3 = scmp.lt.s32.totalorder (!%p113_p2), %s378_s10, 31  ;;  %v170_v2 = vld [vmem:[%s538_s0] sm:$0xff] (!%p113_p2)  ;;  %vm176_vm0 = vcmask (!%p113_p2), 261120   ;;  %v172_v4 = vld [vmem:[%s538_s0 + $0x10] sm:$0xff] (!%p113_p2)  ;;  %s475_s19 = smov (!%p113_p2), 127   ;;  %vm153_vm1 = vcmask (!%p113_p2), 1039360  }
   0x6   : > { %116 = sbr.rel (%p113_p2) target bundleno = 384 (0x180), region = 28  ;;  %413 = vmatprep.mubr.msk.f32.mxu0 (!%p113_p2), %vm176_vm0, %v170_v2  ;;  %416 = vmatprep.mubr.msk.f32.mxu1 (!%p113_p2), %vm176_vm0, %v172_v4  ;;  %s476_s20 = smov (!%p113_p2), 125   ;;  %vm167_vm2 = vcmask (!%p113_p2), 1022976   ;;  %vm160_vm3 = vcmask (!%p113_p2), 1031168   ;;  %v171_v19 = vld [vmem:[%s538_s0 + $0x8] sm:$0xff] (!%p113_p2)  ;;  %v173_v20 = vld [vmem:[%s538_s0 + $0x18] sm:$0xff] (!%p113_p2) }
   0x7   : > { %s477_s21 = smov (!%p113_p2), 126   ;;  %v174_v21 = vld [vmem:[%s538_s0 + $0x20] sm:$0xff] (!%p113_p2)  ;;  %v175_v22 = vld [vmem:[%s538_s0 + $0x28] sm:$0xff] (!%p113_p2) }
   0xd   : > { %s542_s10 = smov (!%p134_p3, %s378_s10), 31 }
   0xe   : > { %s394_s11 = sshll.u32 %s542_s10, 4  ;;  %s434_s30 = smul.u32 24, %s542_s10 }
   0xf   : > { %s138_s14 = scalar_lea.vmem %s539_s1, %s394_s11 }
  0x10   : > { %v145_v0 = vld [vmem:[%s138_s14] sm:$0xff]  ;;  %v146_v1 = vld [vmem:[%s138_s14 + $0x8] sm:$0xff]  ;;  %s143_s5 = scalar_lea.vmem %s540_s2, %s434_s30 }
  0x11   : > { %v446_v3 = vpack.i.bf16 %v146_v1, %v145_v0 }
  0x13   : > { %447 = vrot.lane.b32.xlu0 %v446_v3, %s475_s19  ;;  %457 = vrot.lane.b32.xlu1 %v446_v3, %s476_s20 }
  0x17   : > { %452 = vrot.lane.b32.xlu0 %v446_v3, %s477_s21 }
  0x85   : > { %v448_v5 = vpop.permute.xlu0 %447  ;;  %v458_v6 = vpop.permute.xlu1 %457 }
  0x86   : > { %v450_v7 = vunpack.i.h.bf16 %v448_v5  ;;  %v449_v8 = vunpack.i.l.bf16 %v448_v5  ;;  %v460_v9 = vunpack.i.h.bf16 %v458_v6  ;;  %v459_v10 = vunpack.i.l.bf16 %v458_v6 }
  0x88   : > { %v154_v11 = vsel %vm153_vm1, %v449_v8, %v450_v7  ;;  %v168_v14 = vsel %vm167_vm2, %v459_v10, %v460_v9 }
  0x89   : > { %v422_v12 = vpack.c.bf16 %v154_v11, %v145_v0  ;;  %v453_v13 = vpop.permute.xlu0 %452 }
  0x8a   : > { %v455_v15 = vunpack.i.h.bf16 %v453_v13  ;;  %v454_v16 = vunpack.i.l.bf16 %v453_v13 }
  0x8b   : > { %423 = vmatprep.subr.bf16.mxu0 %v422_v12  ;;  %430 = vmatprep.subr.bf16.mxu1 %v422_v12 }
  0x8c   : > { %v161_v17 = vsel %vm160_vm3, %v454_v16, %v455_v15  ;;  %425 = vmatpush3.bf16.msra.mxu0 %v422_v12  ;;  %432 = vmatpush3.bf16.msra.mxu1 %v422_v12 }
  0x8d   : > { %v426_v18 = vpack.c.bf16 %v168_v14, %v161_v17 }
  0x8f   : > { %427 = vmatprep.subr.bf16.mxu0 %v426_v18  ;;  %431 = vmatprep.subr.bf16.mxu1 %v426_v18 }
  0x90   : > { %429 = vmatpush3.bf16.msra.mxu0 %v426_v18  ;;  %433 = vmatpush3.bf16.msra.mxu1 %v426_v18 }
  0x93   : > { %414 = vmatmul.mubr.msk.f32.vlgmr.msra.gmra.mrb[0].mxu0 %vm176_vm0, %v171_v19  ;;  %417 = vmatmul.mubr.msk.f32.vlgmr.msra.gmra.mrb[0].mxu1 %vm176_vm0, %v173_v20 }
  0x94   : > { %419 = vmatprep.mubr.msk.f32.mxu1 %vm176_vm0, %v174_v21 }
  0x97   : > { %420 = vmatmul.mubr.msk.f32.gmra.mrb[2].mxu1 %vm176_vm0, %v175_v22 }
 0x166   : > { %v415_v23 = vpop.f32.mrb[0].mxu0  ;;  %v418_v24 = vpop.f32.mrb[0].mxu1 }
 0x167   : > { %v293_v25 = vmul.f32 %v418_v24, %v418_v24  ;;  %v261_v26 = vpop.f32.mrb[1].mxu0  ;;  %v271_v27 = vpop.f32.mrb[1].mxu1  ;;  %v291_v34 = vmul.f32 %v415_v23, %v415_v23 }
 0x168   : > { %v290_v28 = vmul.f32 %v261_v26, %v261_v26  ;;  %v292_v31 = vmul.f32 %v271_v27, %v271_v27 }
 0x16a   : > { %v296_v29 = vadd.f32 %v293_v25, %v290_v28  ;;  %v421_v30 = vpop.f32.mrb[2].mxu1 }
 0x16b   : > { %v295_v32 = vmul.f32 %v421_v30, %v421_v30  ;;  %v281_v33 = vpop.f32.mrb[3].mxu1 }
 0x16c   : > { %461 = vrsqrt.f32 %v296_v29  ;;  %v294_v36 = vmul.f32 %v281_v33, %v281_v33  ;;  %vm301_vm4 = vcmp.eq.f32.partialorder %v296_v29, inf  ;;  %v304_v40 = vand.u32 2147483648, %v296_v29 }
 0x16d   : > { %v298_v35 = vadd.f32 %v295_v32, %v292_v31  ;;  %vm303_vm5 = vcmp.eq.f32.partialorder %v296_v29, 0.0 }
 0x16e   : > { %v297_v37 = vadd.f32 %v294_v36, %v291_v34 }
 0x16f   : > { %463 = vrsqrt.f32 %v298_v35  ;;  %vm315_vm6 = vcmp.eq.f32.partialorder %v298_v35, inf  ;;  %v318_v45 = vand.u32 2147483648, %v298_v35  ;;  %vm317_vm7 = vcmp.eq.f32.partialorder %v298_v35, 0.0 }
 0x170   : > { %465 = vrsqrt.f32 %v297_v37  ;;  %vm308_vm8 = vcmp.eq.f32.partialorder %v297_v37, inf  ;;  %v311_v50 = vand.u32 2147483648, %v297_v37  ;;  %vm310_vm9 = vcmp.eq.f32.partialorder %v297_v37, 0.0 }
 0x176   : > { %v462_v38 = vpop.eup %461 }
 0x177   : > { %v300_v39 = vmul.f32 %v462_v38, %v296_v29 }
 0x179   : > { %v464_v41 = vpop.eup %463  ;;  %v302_v42 = vsel %vm301_vm4, %v296_v29, %v300_v39 }
 0x17a   : > { %v305_v43 = vsel %vm303_vm5, %v304_v40, %v302_v42  ;;  %v314_v44 = vmul.f32 %v464_v41, %v298_v35  ;;  %v466_v46 = vpop.eup %465 }
 0x17b   : > { %320 = vst [vmem:[%s143_s5] sm:$0xff] %v305_v43  ;;  %v307_v49 = vmul.f32 %v466_v46, %v297_v37 }
 0x17c   : > { %v316_v47 = vsel %vm315_vm6, %v298_v35, %v314_v44 }
 0x17d   : > { %v319_v48 = vsel %vm317_vm7, %v318_v45, %v316_v47  ;;  %v309_v51 = vsel %vm308_vm8, %v297_v37, %v307_v49 }
 0x17e   : > { %322 = vst [vmem:[%s143_s5 + $0x10] sm:$0xff] %v319_v48  ;;  %v312_v52 = vsel %vm310_vm9, %v311_v50, %v309_v51 }
 0x17f   : > { %321 = vst [vmem:[%s143_s5 + $0x8] sm:$0xff] %v312_v52 }
 0x180 PF: > { %s12_s9 = sadd.s32 1, %s473_s9  }
 0x181   : > { %p9_p4 = scmp.ge.s32.totalorder %s12_s9, 34  }
 0x183   :  { %11 = sbr.rel (!%p9_p4) target bundleno = 1 (0x1), region = 58 }

// kernel: perceptual_loss.8
= control target key start
LH: loop header
LB: loop body
LE: loop exit
PB: predicated region body
PF: predicated region fallthrough
CT: control target
= control target key end

     0   :  { %s736_s12 = smov 0   ;;  %s738_s13 = smov 0   ;;  %s840_s0 = inlined_call_operand.vmem [shape: bf16[8,27], index: 0, kind: input, shape index: {}]   ;;  %s841_s1 = inlined_call_operand.vmem [shape: bf16[27,3072], index: 1, kind: input, shape index: {}]   ;;  %s842_s2 = inlined_call_operand.vmem [shape: f32[8,1], index: 2, kind: input, shape index: {}]   ;;  %s843_s3 = inlined_call_operand.vmem [shape: bf16[8,3072], index: 3, kind: output, shape index: {}]  }
   0x1   :  { %s740_s14 = smov 0  }
   0x2 LB: > { %s621_s15 = sadd.s32 4294967295, %s712_s14   ;;  %s753_s16 = sadd.s32 1, %s712_s14   ;;  %s712_s14 = sphi %s740_s14, %s846_s14   ;;  %s708_s13 = sphi %s738_s13, %s845_s13   ;;  %s704_s12 = sphi %s736_s12, %s844_s12  }
   0x3   : > { %s38_s17 = ssub.s32 %s712_s14, %s753_s16  ;;  %s41_s18 = sadd.s32 1, %s708_s13 }
   0x4   : > { %p39_p0 = scmp.eq.s32.totalorder %s38_s17, 0  ;;  %p48_p1 = scmp.ne.s32.totalorder %s708_s13, %s704_s12 }
   0x5   : > { %p49_p2 = scmp.eq.s32.totalorder %s712_s14, 0  ;;  %p624_p4 = scmp.ge.s32.totalorder %s712_s14, 3 }
   0x6   : > { %s762_s19 = scalar_select %p39_p0, %s708_s13, %s41_s18  }
   0x7   : > { %p50_p3 = por %p49_p2, %p48_p1  ;;  %127 = sbr.rel (%p624_p4) target bundleno = 26 (0x1a), region = 24 }
   0xe   : > { %130 = sbr.rel (!%p50_p3) target bundleno = 26 (0x1a), region = 28  ;;  %s132_s20 = sand.u32 (%p50_p3), 1, %s708_s13  }
   0xf   : > { %s658_s21 = sshll.u32 (%p50_p3), %s712_s14, 5  ;;  %s625_s22 = sshll.u32 (%p50_p3), %s132_s20, 7 }
  0x10   : > { %s770_s25 = scalar_lea.vmem (%p50_p3), %s841_s1, %s658_s21  ;;  %s134_s26 = scalar_lea.vmem (%p50_p3), [#allocation2], %s625_s22 }
  0x11   : > { %v150_v0 = vld [vmem:[%s770_s25] sm:$0xff] (%p50_p3)  ;;  %v152_v1 = vld [vmem:[%s770_s25 + $0x8] sm:$0xff] (%p50_p3)  ;;  %v154_v2 = vld [vmem:[%s770_s25 + $0x10] sm:$0xff] (%p50_p3) }
  0x12   : > { %151 = vst [vmem:[%s134_s26] sm:$0xff] (%p50_p3), %v150_v0  ;;  %153 = vst [vmem:[%s134_s26 + $0x8] sm:$0xff] (%p50_p3), %v152_v1  ;;  %v156_v3 = vld [vmem:[%s770_s25 + $0x18] sm:$0xff] (%p50_p3)  ;;  %v158_v4 = vld [vmem:[%s770_s25 + $0x60] sm:$0xff] (%p50_p3) }
  0x13   : > { %155 = vst [vmem:[%s134_s26 + $0x10] sm:$0xff] (%p50_p3), %v154_v2  ;;  %v160_v5 = vld [vmem:[%s770_s25 + $0x68] sm:$0xff] (%p50_p3)  ;;  %157 = vst [vmem:[%s134_s26 + $0x18] sm:$0xff] (%p50_p3), %v156_v3  ;;  %v162_v6 = vld [vmem:[%s770_s25 + $0x70] sm:$0xff] (%p50_p3) }
  0x14   : > { %159 = vst [vmem:[%s134_s26 + $0x20] sm:$0xff] (%p50_p3), %v158_v4  ;;  %161 = vst [vmem:[%s134_s26 + $0x28] sm:$0xff] (%p50_p3), %v160_v5  ;;  %v164_v7 = vld [vmem:[%s770_s25 + $0x78] sm:$0xff] (%p50_p3)  ;;  %v166_v8 = vld [vmem:[%s770_s25 + $0xc0] sm:$0xff] (%p50_p3) }
  0x15   : > { %163 = vst [vmem:[%s134_s26 + $0x30] sm:$0xff] %v162_v6  ;;  %165 = vst [vmem:[%s134_s26 + $0x38] sm:$0xff] %v164_v7  ;;  %v168_v9 = vld [vmem:[%s770_s25 + $0xc8] sm:$0xff]  ;;  %v170_v10 = vld [vmem:[%s770_s25 + $0xd0] sm:$0xff] }
  0x16   : > { %167 = vst [vmem:[%s134_s26 + $0x40] sm:$0xff] %v166_v8  ;;  %v172_v11 = vld [vmem:[%s770_s25 + $0xd8] sm:$0xff]  ;;  %169 = vst [vmem:[%s134_s26 + $0x48] sm:$0xff] %v168_v9  ;;  %v174_v12 = vld [vmem:[%s770_s25 + $0x120] sm:$0xff] }
  0x17   : > { %171 = vst [vmem:[%s134_s26 + $0x50] sm:$0xff] %v170_v10  ;;  %173 = vst [vmem:[%s134_s26 + $0x58] sm:$0xff] %v172_v11  ;;  %v176_v13 = vld [vmem:[%s770_s25 + $0x128] sm:$0xff]  ;;  %v178_v14 = vld [vmem:[%s770_s25 + $0x130] sm:$0xff] }
  0x18   : > { %175 = vst [vmem:[%s134_s26 + $0x60] sm:$0xff] %v174_v12  ;;  %177 = vst [vmem:[%s134_s26 + $0x68] sm:$0xff] %v176_v13  ;;  %v180_v15 = vld [vmem:[%s770_s25 + $0x138] sm:$0xff] }
  0x19   : > { %179 = vst [vmem:[%s134_s26 + $0x70] sm:$0xff] %v178_v14  ;;  %181 = vst [vmem:[%s134_s26 + $0x78] sm:$0xff] %v180_v15 }
  0x1a PF: > { %p628_p5 = scmp.ge.s32.totalorder %s712_s14, 1  ;;  %p186_p6 = scmp.lt.s32.totalorder %s712_s14, 4 }
  0x1c   : > { %p187_p7 = pnand %p628_p5, %p186_p6 }
  0x1d   : > { %s193_s27 = sand.u32 (!%p187_p7), 1, %s704_s12   ;;  %vm323_vm0 = vcmask (!%p187_p7), 1044480   ;;  %v241_v16 = vld [vmem:[%s842_s2] sm:$0xff] (!%p187_p7)  ;;  %vm324_vm1 = vcmask (!%p187_p7), 1045504   ;;  %v714_v17 = vmov (!%p187_p7), 65535   ;;  %v715_v19 = vmov (!%p187_p7), 0  }
  0x1e   : > { %190 = sbr.rel (%p187_p7) target bundleno = 273 (0x111), region = 51  ;;  %s629_s30 = sshll.u32 (!%p187_p7), %s193_s27, 7  ;;  %v325_v18 = vsel (!%p187_p7), %vm323_vm0, 4294967295, %v714_v17  ;;  %383 = vmatprep.mubr.bf16.mxu0 (!%p187_p7), %v715_v19  ;;  %424 = vmatprep.mubr.bf16.mxu1 (!%p187_p7), %v715_v19  ;;  %v224_v53 = vld [vmem:[%s840_s0] sm:$0xf] (!%p187_p7)  ;;  %vm319_vm2 = vcmask (!%p187_p7), 220160  }
  0x1f   : > { %689 = vset.pattern.permute.xlu0 (!%p187_p7), %v715_v19  ;;  %s797_s4 = scalar_lea.vmem (!%p187_p7), [#allocation2], %s629_s30  ;;  %v326_v28 = vsel (!%p187_p7), %vm324_vm1, %v325_v18, 0  ;;  %s630_s7 = sshll.u32 (!%p187_p7), %s621_s15, 3 }
  0x20   : > { %v225_v20 = vld [vmem:[%s797_s4] sm:$0xff] (!%p187_p7)  ;;  %v226_v22 = vld [vmem:[%s797_s4 + $0x8] sm:$0xff] (!%p187_p7)  ;;  %244 = vperm.xlu0 (!%p187_p7), %689, %v241_v16   ;;  %v227_v35 = vld [vmem:[%s797_s4 + $0x10] sm:$0xff] (!%p187_p7)  ;;  %p218_p8 = scmp.lt.s32.totalorder (!%p187_p7), %s630_s7, 23 }
  0x21   : > { %v229_v21 = vld [vmem:[%s797_s4 + $0x20] sm:$0xff] (!%p187_p7)  ;;  %v230_v24 = vld [vmem:[%s797_s4 + $0x28] sm:$0xff] (!%p187_p7)  ;;  %v231_v38 = vld [vmem:[%s797_s4 + $0x30] sm:$0xff] (!%p187_p7) }
  0x22   : > { %v633_v23 = vcombine.high (!%p187_p7), %v225_v20, %v229_v21  ;;  %v632_v25 = vcombine.low (!%p187_p7), %v225_v20, %v229_v21  ;;  %v233_v26 = vld [vmem:[%s797_s4 + $0x40] sm:$0xff] (!%p187_p7)  ;;  %v635_v29 = vcombine.high (!%p187_p7), %v226_v22, %v230_v24  ;;  %v634_v30 = vcombine.low (!%p187_p7), %v226_v22, %v230_v24  ;;  %v234_v32 = vld [vmem:[%s797_s4 + $0x48] sm:$0xff] (!%p187_p7)  ;;  %v228_v39 = vld [vmem:[%s797_s4 + $0x18] sm:$0xff] (!%p187_p7) }
  0x23   : > { %v237_v27 = vld [vmem:[%s797_s4 + $0x60] sm:$0x33] (!%p187_p7)  ;;  %v238_v33 = vld [vmem:[%s797_s4 + $0x68] sm:$0x33] (!%p187_p7)  ;;  %v232_v40 = vld [vmem:[%s797_s4 + $0x38] sm:$0xff] (!%p187_p7)  ;;  %v637_v48 = vcombine.high (!%p187_p7), %v227_v35, %v231_v38  ;;  %v636_v54 = vcombine.low (!%p187_p7), %v227_v35, %v231_v38 }
  0x24   : > { %v641_v31 = vcombine.high (!%p187_p7), %v233_v26, %v237_v27  ;;  %v640_v34 = vcombine.low (!%p187_p7), %v233_v26, %v237_v27  ;;  %351 = vmatprep.subr.bf16.mxu0 (!%p187_p7), %v633_v23  ;;  %v643_v36 = vcombine.high (!%p187_p7), %v234_v32, %v238_v33  ;;  %v642_v37 = vcombine.low (!%p187_p7), %v234_v32, %v238_v33  ;;  %v235_v43 = vld [vmem:[%s797_s4 + $0x50] sm:$0xff] (!%p187_p7)  ;;  %v236_v45 = vld [vmem:[%s797_s4 + $0x58] sm:$0xff] (!%p187_p7) }
  0x25   : > { %392 = vmatprep.subr.bf16.mxu1 %v635_v29  ;;  %352 = vmatpush1.bf16.msra.mxu0 %v632_v25  ;;  %v239_v44 = vld [vmem:[%s797_s4 + $0x70] sm:$0x33]  ;;  %v240_v49 = vld [vmem:[%s797_s4 + $0x78] sm:$0x33]  ;;  %v639_v50 = vcombine.high %v228_v39, %v232_v40  ;;  %v638_v56 = vcombine.low %v228_v39, %v232_v40  ;;  %s848_s7 = smov (!%p218_p8, %s630_s7), 23 }
  0x26   : > { %v331_v41 = vand.u32 %v641_v31, %v326_v28  ;;  %v328_v42 = vand.u32 %v640_v34, %v326_v28  ;;  %393 = vmatpush1.bf16.msra.mxu1 %v634_v30  ;;  %v337_v46 = vand.u32 %v643_v36, %v326_v28  ;;  %v334_v47 = vand.u32 %v642_v37, %v326_v28  ;;  %s631_s8 = sshll.u32 %s848_s7, 2 }
  0x27   : > { %v645_v51 = vcombine.high %v235_v43, %v239_v44  ;;  %v647_v52 = vcombine.high %v236_v45, %v240_v49  ;;  %v644_v55 = vcombine.low %v235_v43, %v239_v44  ;;  %v646_v58 = vcombine.low %v236_v45, %v240_v49  ;;  %s221_s11 = scalar_lea.vmem %s843_s3, %s631_s8 }
  0x28   : > { %353 = vmatprep.subr.bf16.mxu0 %v331_v41  ;;  %394 = vmatprep.subr.bf16.mxu1 %v337_v46 }
  0x29   : > { %354 = vmatpush1.bf16.msra.mxu0 %v328_v42  ;;  %v343_v57 = vand.u32 %v645_v51, %v326_v28  ;;  %v349_v59 = vand.u32 %v647_v52, %v326_v28  ;;  %v340_v60 = vand.u32 %v644_v55, %v326_v28  ;;  %v346_v61 = vand.u32 %v646_v58, %v326_v28 }
  0x2a   : > { %395 = vmatpush1.bf16.msra.mxu1 %v334_v47  ;;  %433 = vmatprep.subr.bf16.mxu0 %v637_v48 }
  0x2b   : > { %474 = vmatprep.subr.bf16.mxu1 %v639_v50 }
  0x2c   : > { %648 = vmatmul.mubr.msk.bf16.vlgmr.msra.gmra.mrb[0].mxu0 %vm319_vm2, %v224_v53 }
  0x2d   : > { %649 = vmatmul.mubr.msk.bf16.vlgmr.msra.gmra.mrb[0].mxu1 %vm319_vm2, %v224_v53  ;;  %434 = vmatpush1.bf16.msra.mxu0 %v636_v54 }
  0x2e   : > { %475 = vmatpush1.bf16.msra.mxu1 %v638_v56  ;;  %435 = vmatprep.subr.bf16.mxu0 %v343_v57 }
  0x2f   : > { %476 = vmatprep.subr.bf16.mxu1 %v349_v59  ;;  %465 = vmatprep.mubr.bf16.mxu0 %v715_v19 }
  0x30   : > { %506 = vmatprep.mubr.bf16.mxu1 %v715_v19 }
  0x31   : > { %436 = vmatpush1.bf16.msra.mxu0 %v340_v60 }
  0x32   : > { %477 = vmatpush1.bf16.msra.mxu1 %v346_v61 }
  0x34   : > { %650 = vmatmul.mubr.msk.bf16.vlgmr.msra.gmra.mrb[4].mxu0 %vm319_vm2, %v224_v53 }
  0x35   : > { %651 = vmatmul.mubr.msk.bf16.vlgmr.msra.gmra.mrb[4].mxu1 %vm319_vm2, %v224_v53 }
  0x9f   : > { %v245_v62 = vpop.permute.xlu0 %244 }
  0xff   : > { %v385_v63 = vpop.f32.mrb[0].mxu0 }
 0x100   : > { %v426_v0 = vpop.f32.mrb[0].mxu1  ;;  %v386_v1 = vadd.f32 %v385_v63, %v245_v62  ;;  %v387_v2 = vpop.f32.mrb[1].mxu0 }
 0x101   : > { %v388_v3 = vadd.f32 %v387_v2, %v245_v62  ;;  %v427_v4 = vadd.f32 %v426_v0, %v245_v62  ;;  %v428_v5 = vpop.f32.mrb[1].mxu1  ;;  %v389_v6 = vpop.f32.mrb[2].mxu0 }
 0x102   : > { %v515_v7 = vmax.f32 %v386_v1, 0.0  ;;  %v429_v8 = vadd.f32 %v428_v5, %v245_v62  ;;  %v430_v9 = vpop.f32.mrb[2].mxu1  ;;  %v390_v10 = vpop.f32.mrb[3].mxu0 }
 0x103   : > { %v516_v11 = vmax.f32 %v388_v3, 0.0  ;;  %v517_v12 = vmax.f32 %v427_v4, 0.0  ;;  %v431_v13 = vpop.f32.mrb[3].mxu1 }
 0x104   : > { %v518_v14 = vmax.f32 %v429_v8, 0.0 }
 0x105   : > { %v659_v15 = vpack.c.bf16 %v516_v11, %v515_v7 }
 0x106   : > { %v660_v16 = vpack.c.bf16 %v518_v14, %v517_v12 }
 0x107   : > { %555 = vst [vmem:[%s221_s11] sm:$0xff] %v659_v15  ;;  %v467_v17 = vpop.f32.mrb[4].mxu0 }
 0x108   : > { %556 = vst [vmem:[%s221_s11 + $0x8] sm:$0xff] %v660_v16  ;;  %v468_v18 = vadd.f32 %v467_v17, %v245_v62  ;;  %v508_v19 = vpop.f32.mrb[4].mxu1  ;;  %v469_v20 = vpop.f32.mrb[5].mxu0 }
 0x109   : > { %v509_v21 = vadd.f32 %v508_v19, %v245_v62  ;;  %v470_v22 = vadd.f32 %v469_v20, %v245_v62  ;;  %v510_v23 = vpop.f32.mrb[5].mxu1  ;;  %v471_v24 = vpop.f32.mrb[6].mxu0 }
 0x10a   : > { %v519_v25 = vmax.f32 %v468_v18, 0.0  ;;  %v511_v26 = vadd.f32 %v510_v23, %v245_v62  ;;  %v512_v27 = vpop.f32.mrb[6].mxu1  ;;  %v472_v28 = vpop.f32.mrb[7].mxu0 }
 0x10b   : > { %v521_v29 = vmax.f32 %v509_v21, 0.0  ;;  %v520_v30 = vmax.f32 %v470_v22, 0.0  ;;  %v513_v31 = vpop.f32.mrb[7].mxu1 }
 0x10c   : > { %v522_v32 = vmax.f32 %v511_v26, 0.0 }
 0x10d   : > { %v661_v33 = vpack.c.bf16 %v520_v30, %v519_v25 }
 0x10e   : > { %v662_v34 = vpack.c.bf16 %v522_v32, %v521_v29 }
 0x10f   : > { %557 = vst [vmem:[%s221_s11 + $0x10] sm:$0xff] %v661_v33 }
 0x110   : > { %558 = vst [vmem:[%s221_s11 + $0x18] sm:$0xff] %v662_v34 }
 0x111 PF: > { %p10_p9 = scmp.ge.s32.totalorder %s753_s16, 5   ;;  %s844_s12 = smov %s708_s13 }
 0x112   : > { %s845_s13 = smov %s762_s19  ;;  %s846_s14 = smov %s753_s16 }
 0x113   :  { %12 = sbr.rel (!%p10_p9) target bundleno = 2 (0x2), region = 90 }

// kernel: perceptual_loss.11
= control target key start
LH: loop header
LB: loop body
LE: loop exit
PB: predicated region body
PF: predicated region fallthrough
CT: control target
= control target key end

     0   :  { %v380_v0 = vmov 0   ;;  %v381_v61 = vmov 1935823168   ;;  %vm307_vm0 = vcmask 7168   ;;  %s637_s2 = inlined_call_operand.vmem [shape: f32[8,1,1], index: 2, kind: input, shape index: {}]   ;;  %s638_s0 = inlined_call_operand.vmem [shape: bf16[8,8,256], index: 0, kind: input, shape index: {}]   ;;  %s639_s1 = inlined_call_operand.vmem [shape: bf16[8,8,256], index: 1, kind: input, shape index: {}]   ;;  %s640_s3 = inlined_call_operand.vmem [shape: f32[8,1], index: 3, kind: output, shape index: {}]  }
   0x1   :  { %323 = vset.pattern.permute.xlu1 %v380_v0  ;;  %322 = vset.pattern.permute.xlu0 %v380_v0  ;;  %v315_v1 = vld [vmem:[%s637_s2 + $0x2] ss:$0 sm:$0xff]  ;;  %v313_v2 = vld [vmem:[%s637_s2] ss:$0 sm:$0xff]  ;;  %v316_v3 = vld [vmem:[%s637_s2 + $0x3] ss:$0 sm:$0xff]  ;;  %v368_v62 = vunpack.c.l.s4 %v381_v61  ;;  %v370_v0 = vlaneseq }
   0x2   :  { %251 = vperm.xlu1 %323, %v315_v1   ;;  %243 = vperm.xlu0 %322, %v313_v2   ;;  %v314_v4 = vld [vmem:[%s637_s2 + $0x1] ss:$0 sm:$0xff]  ;;  %v318_v5 = vld [vmem:[%s637_s2 + $0x5] ss:$0 sm:$0xff]  ;;  %v317_v6 = vld [vmem:[%s637_s2 + $0x4] ss:$0 sm:$0xff] }
   0x3   :  { %v320_v7 = vld [vmem:[%s637_s2 + $0x7] ss:$0 sm:$0xff]  ;;  %v319_v8 = vld [vmem:[%s637_s2 + $0x6] ss:$0 sm:$0xff]  ;;  %v434_v10 = vld [vmem:[%s638_s0 + $0x8] sm:$0xff]  ;;  %v369_v63 = vunpack.c.0.s8 %v368_v62  ;;  %v371_v1 = vshrl.u32 %v370_v0, 7 }
   0x4   :  { %v429_v9 = vld [vmem:[%s638_s0] sm:$0xff]  ;;  %v444_v12 = vld [vmem:[%s639_s1 + $0x8] sm:$0xff]  ;;  %v24_v14 = vunpack.c.l.bf16 %v434_v10  ;;  %v451_v15 = vld [vmem:[%s638_s0 + $0x10] sm:$0xff]  ;;  %v25_v17 = vunpack.c.h.bf16 %v434_v10 }
   0x5   :  { %v439_v11 = vld [vmem:[%s639_s1] sm:$0xff]  ;;  %v22_v13 = vunpack.c.l.bf16 %v429_v9  ;;  %v23_v16 = vunpack.c.h.bf16 %v429_v9  ;;  %v48_v19 = vunpack.c.l.bf16 %v444_v12  ;;  %v460_v20 = vld [vmem:[%s639_s1 + $0x10] sm:$0xff]  ;;  %v49_v22 = vunpack.c.h.bf16 %v444_v12  ;;  %v468_v24 = vld [vmem:[%s638_s0 + $0x18] sm:$0xff] }
   0x6   :  { %255 = vperm.xlu1 %323, %v316_v3   ;;  %247 = vperm.xlu0 %322, %v314_v4   ;;  %v46_v18 = vunpack.c.l.bf16 %v439_v11  ;;  %v47_v21 = vunpack.c.h.bf16 %v439_v11  ;;  %v26_v23 = vunpack.c.l.bf16 %v451_v15  ;;  %v27_v25 = vunpack.c.h.bf16 %v451_v15  ;;  %v475_v27 = vld [vmem:[%s639_s1 + $0x18] sm:$0xff]  ;;  %v486_v30 = vld [vmem:[%s638_s0 + $0x20] sm:$0xff]  ;;  %v506_v36 = vld [vmem:[%s638_s0 + $0x28] sm:$0xff] }
   0x7   :  { %v50_v26 = vunpack.c.l.bf16 %v460_v20  ;;  %v51_v28 = vunpack.c.h.bf16 %v460_v20  ;;  %v28_v29 = vunpack.c.l.bf16 %v468_v24  ;;  %356 = vmul.bf16.f32.vacc1 %v429_v9, %v429_v9  ;;  %v497_v33 = vld [vmem:[%s639_s1 + $0x20] sm:$0xff]  ;;  %v515_v39 = vld [vmem:[%s639_s1 + $0x28] sm:$0xff]  ;;  %v524_v42 = vld [vmem:[%s638_s0 + $0x30] sm:$0xff] }
   0x8   :  { %357 = vmac.bf16.f32.vacc1 %v434_v10, %v434_v10  ;;  %v29_v31 = vunpack.c.h.bf16 %v468_v24  ;;  %v52_v32 = vunpack.c.l.bf16 %v475_v27  ;;  %332 = vmul.bf16.f32.vacc0 %v439_v11, %v439_v11  ;;  %v533_v45 = vld [vmem:[%s639_s1 + $0x30] sm:$0xff]  ;;  %v542_v48 = vld [vmem:[%s638_s0 + $0x38] sm:$0xff] }
   0x9   :  { %333 = vmac.bf16.f32.vacc0 %v444_v12, %v444_v12  ;;  %v53_v34 = vunpack.c.h.bf16 %v475_v27  ;;  %v30_v35 = vunpack.c.l.bf16 %v486_v30  ;;  %358 = vmac.bf16.f32.vacc1 %v451_v15, %v451_v15  ;;  %v551_v51 = vld [vmem:[%s639_s1 + $0x38] sm:$0xff] }
   0xa   :  { %263 = vperm.xlu1 %323, %v318_v5   ;;  %259 = vperm.xlu0 %322, %v317_v6   ;;  %v31_v37 = vunpack.c.h.bf16 %v486_v30  ;;  %v54_v38 = vunpack.c.l.bf16 %v497_v33  ;;  %334 = vmac.bf16.f32.vacc0 %v460_v20, %v460_v20  ;;  %v55_v40 = vunpack.c.h.bf16 %v497_v33 }
   0xb   :  { %v32_v41 = vunpack.c.l.bf16 %v506_v36  ;;  %359 = vmac.bf16.f32.vacc1 %v468_v24, %v468_v24  ;;  %v33_v43 = vunpack.c.h.bf16 %v506_v36  ;;  %v56_v44 = vunpack.c.l.bf16 %v515_v39 }
   0xc   :  { %335 = vmac.bf16.f32.vacc0 %v475_v27, %v475_v27  ;;  %v57_v46 = vunpack.c.h.bf16 %v515_v39  ;;  %v34_v47 = vunpack.c.l.bf16 %v524_v42  ;;  %360 = vmac.bf16.f32.vacc1 %v486_v30, %v486_v30 }
   0xd   :  { %v35_v49 = vunpack.c.h.bf16 %v524_v42  ;;  %336 = vmac.bf16.f32.vacc0 %v497_v33, %v497_v33  ;;  %v36_v53 = vunpack.c.l.bf16 %v542_v48  ;;  %361 = vmac.bf16.f32.vacc1 %v506_v36, %v506_v36 }
   0xe   :  { %271 = vperm.xlu1 %323, %v320_v7   ;;  %267 = vperm.xlu0 %322, %v319_v8   ;;  %v37_v54 = vunpack.c.h.bf16 %v542_v48  ;;  %337 = vmac.bf16.f32.vacc0 %v515_v39, %v515_v39  ;;  %362 = vmac.bf16.f32.vacc1 %v524_v42, %v524_v42  ;;  %v372_v2 = vsub.s32 %v369_v63, %v371_v1 }
   0xf   :  { %338 = vmac.bf16.f32.vacc0 %v533_v45, %v533_v45  ;;  %363 = vmac.bf16.f32.vacc1 %v542_v48, %v542_v48 }
  0x10   :  { %339 = vmac.bf16.f32.vacc0 %v551_v51, %v551_v51 }
  0x11   :  { %v364_v57 = vmovacc.add.low.vacc1 }
  0x12   :  { %v365_v58 = vmovacc.add.high.vacc1  ;;  %v340_v5 = vmovacc.add.low.vacc0 }
  0x13   :  { %v341_v6 = vmovacc.add.high.vacc0 }
  0x14   :  { %v366_v59 = vcombine.low %v364_v57, %v365_v58  ;;  %v367_v60 = vcombine.high %v364_v57, %v365_v58 }
  0x15   :  { %v342_v7 = vcombine.low %v340_v5, %v341_v6  ;;  %v343_v8 = vcombine.high %v340_v5, %v341_v6 }
  0x16   :  { %v373_v3 = vrot.slane %v366_v59, %v372_v2  ;;  %v379_v4 = vrot.slane %v367_v60, %v372_v2 }
  0x17   :  { %v349_v56 = vrot.slane %v342_v7, %v372_v2  ;;  %v355_v55 = vrot.slane %v343_v8, %v372_v2 }
  0x18   :  { %v92_v52 = vadd.f32 1e-20, %v373_v3  ;;  %v93_v50 = vadd.f32 1e-20, %v379_v4  ;;  %v641_v3 = vunpack.c.l.bf16 %v533_v45 }
  0x19   :  { %v126_v57 = vadd.f32 1e-20, %v349_v56  ;;  %v127_v58 = vadd.f32 1e-20, %v355_v55 }
  0x1a   :  { %324 = vrsqrt.f32 %v92_v52 }
  0x1b   :  { %326 = vrsqrt.f32 %v93_v50 }
  0x1c   :  { %328 = vrsqrt.f32 %v126_v57  ;;  %v643_v57 = vunpack.c.l.bf16 %v551_v51 }
  0x1d   :  { %330 = vrsqrt.f32 %v127_v58 }
  0x24   :  { %v325_v61 = vpop.eup %324 }
  0x25   :  { %v327_v59 = vpop.eup %326  ;;  %v130_v63 = vmul.f32 %v325_v61, %v22_v13  ;;  %v132_v1 = vmul.f32 %v325_v61, %v24_v14  ;;  %v134_v9 = vmul.f32 %v325_v61, %v26_v23  ;;  %v136_v10 = vmul.f32 %v325_v61, %v28_v29 }
  0x26   :  { %v329_v60 = vpop.eup %328  ;;  %v131_v0 = vmul.f32 %v327_v59, %v23_v16  ;;  %v133_v55 = vmul.f32 %v327_v59, %v25_v17  ;;  %v135_v14 = vmul.f32 %v327_v59, %v27_v25  ;;  %v137_v16 = vmul.f32 %v327_v59, %v29_v31 }
  0x27   :  { %v331_v62 = vpop.eup %330  ;;  %v146_v50 = vmul.f32 %v329_v60, %v46_v18  ;;  %v148_v56 = vmul.f32 %v329_v60, %v48_v19  ;;  %v150_v11 = vmul.f32 %v329_v60, %v50_v26  ;;  %v152_v12 = vmul.f32 %v329_v60, %v52_v32 }
  0x28   :  { %v147_v52 = vmul.f32 %v331_v62, %v47_v21  ;;  %v149_v13 = vmul.f32 %v331_v62, %v49_v22  ;;  %v151_v17 = vmul.f32 %v331_v62, %v51_v28  ;;  %v153_v18 = vmul.f32 %v331_v62, %v53_v34 }
  0x29   :  { %v140_v15 = vmul.f32 %v325_v61, %v32_v41  ;;  %v141_v19 = vmul.f32 %v327_v59, %v33_v43  ;;  %v138_v21 = vmul.f32 %v325_v61, %v30_v35  ;;  %v139_v22 = vmul.f32 %v327_v59, %v31_v37 }
  0x2a   :  { %v162_v20 = vsub.f32 %v130_v63, %v146_v50  ;;  %v163_v23 = vsub.f32 %v131_v0, %v147_v52  ;;  %v164_v24 = vsub.f32 %v132_v1, %v148_v56  ;;  %v165_v25 = vsub.f32 %v133_v55, %v149_v13 }
  0x2b   :  { %v154_v26 = vmul.f32 %v329_v60, %v54_v38  ;;  %v155_v27 = vmul.f32 %v331_v62, %v55_v40  ;;  %v144_v28 = vmul.f32 %v325_v61, %v36_v53  ;;  %v145_v29 = vmul.f32 %v327_v59, %v37_v54 }
  0x2c   :  { %v166_v31 = vsub.f32 %v134_v9, %v150_v11  ;;  %v167_v32 = vsub.f32 %v135_v14, %v151_v17  ;;  %v168_v30 = vsub.f32 %v136_v10, %v152_v12  ;;  %v169_v34 = vsub.f32 %v137_v16, %v153_v18 }
  0x2d   :  { %v156_v37 = vmul.f32 %v329_v60, %v56_v44  ;;  %v157_v38 = vmul.f32 %v331_v62, %v57_v46  ;;  %v142_v33 = vmul.f32 %v325_v61, %v34_v47  ;;  %v143_v40 = vmul.f32 %v327_v59, %v35_v49 }
  0x2e   :  { %v178_v41 = vmul.f32 %v162_v20, %v162_v20  ;;  %v179_v43 = vmul.f32 %v163_v23, %v163_v23  ;;  %v180_v48 = vmul.f32 %v164_v24, %v164_v24  ;;  %v181_v53 = vmul.f32 %v165_v25, %v165_v25 }
  0x2f   :  { %v170_v54 = vsub.f32 %v138_v21, %v154_v26  ;;  %v171_v2 = vsub.f32 %v139_v22, %v155_v27  ;;  %v158_v4 = vmul.f32 %v329_v60, %v641_v3  ;;  %v642_v44 = vunpack.c.h.bf16 %v533_v45 }
  0x30   :  { %v182_v39 = vmul.f32 %v166_v31, %v166_v31  ;;  %v183_v46 = vmul.f32 %v167_v32, %v167_v32  ;;  %v184_v6 = vmul.f32 %v168_v30, %v168_v30  ;;  %v185_v7 = vmul.f32 %v169_v34, %v169_v34 }
  0x31   :  { %v159_v5 = vmul.f32 %v331_v62, %v642_v44  ;;  %v172_v42 = vsub.f32 %v140_v15, %v156_v37  ;;  %v173_v49 = vsub.f32 %v141_v19, %v157_v38  ;;  %v160_v58 = vmul.f32 %v329_v60, %v643_v57 }
  0x32   :  { %v644_v61 = vunpack.c.h.bf16 %v551_v51  ;;  %v186_v45 = vmul.f32 %v170_v54, %v170_v54  ;;  %v187_v50 = vmul.f32 %v171_v2, %v171_v2  ;;  %v174_v52 = vsub.f32 %v142_v33, %v158_v4 }
  0x33   :  { %v175_v56 = vsub.f32 %v143_v40, %v159_v5  ;;  %v188_v11 = vmul.f32 %v172_v42, %v172_v42  ;;  %v189_v17 = vmul.f32 %v173_v49, %v173_v49  ;;  %v176_v60 = vsub.f32 %v144_v28, %v160_v58 }
  0x34   :  { %v161_v59 = vmul.f32 %v331_v62, %v644_v61  ;;  %v190_v21 = vmul.f32 %v174_v52, %v174_v52 }
  0x35   :  { %v191_v22 = vmul.f32 %v175_v56, %v175_v56  ;;  %v192_v26 = vmul.f32 %v176_v60, %v176_v60 }
  0x36   :  { %v177_v18 = vsub.f32 %v145_v29, %v161_v59 }
  0x38   :  { %v193_v27 = vmul.f32 %v177_v18, %v177_v18 }
  0x81   :  { %v252_v35 = vpop.permute.xlu1 %251  ;;  %v244_v36 = vpop.permute.xlu0 %243 }
  0x82   :  { %v274_v63 = vmul.f32 %v244_v36, %v178_v41  ;;  %v275_v0 = vmul.f32 %v244_v36, %v179_v43  ;;  %v278_v13 = vmul.f32 %v252_v35, %v182_v39  ;;  %v279_v9 = vmul.f32 %v252_v35, %v183_v46 }
  0x85   :  { %v256_v47 = vpop.permute.xlu1 %255  ;;  %v248_v8 = vpop.permute.xlu0 %247 }
  0x86   :  { %v276_v1 = vmul.f32 %v248_v8, %v180_v48  ;;  %v277_v55 = vmul.f32 %v248_v8, %v181_v53  ;;  %v280_v51 = vmul.f32 %v256_v47, %v184_v6  ;;  %v281_v62 = vmul.f32 %v256_v47, %v185_v7 }
  0x88   :  { %v290_v14 = vadd.f32 %v276_v1, %v274_v63  ;;  %v297_v10 = vadd.f32 %v277_v55, %v275_v0 }
  0x89   :  { %v264_v16 = vpop.permute.xlu1 %263  ;;  %v260_v12 = vpop.permute.xlu0 %259 }
  0x8a   :  { %v291_v15 = vadd.f32 %v290_v14, %v278_v13  ;;  %v298_v19 = vadd.f32 %v297_v10, %v279_v9  ;;  %v282_v20 = vmul.f32 %v260_v12, %v186_v45  ;;  %v283_v23 = vmul.f32 %v260_v12, %v187_v50 }
  0x8b   :  { %v284_v32 = vmul.f32 %v264_v16, %v188_v11  ;;  %v285_v30 = vmul.f32 %v264_v16, %v189_v17 }
  0x8c   :  { %v292_v24 = vadd.f32 %v291_v15, %v280_v51  ;;  %v299_v25 = vadd.f32 %v298_v19, %v281_v62 }
  0x8d   :  { %v268_v31 = vpop.permute.xlu0 %267  ;;  %v272_v36 = vpop.permute.xlu1 %271 }
  0x8e   :  { %v293_v34 = vadd.f32 %v292_v24, %v282_v20  ;;  %v300_v35 = vadd.f32 %v299_v25, %v283_v23  ;;  %v286_v28 = vmul.f32 %v268_v31, %v190_v21  ;;  %v287_v29 = vmul.f32 %v268_v31, %v191_v22 }
  0x8f   :  { %v288_v33 = vmul.f32 %v272_v36, %v192_v26  ;;  %v289_v40 = vmul.f32 %v272_v36, %v193_v27 }
  0x90   :  { %v294_v37 = vadd.f32 %v293_v34, %v284_v32  ;;  %v301_v38 = vadd.f32 %v300_v35, %v285_v30 }
  0x92   :  { %v295_v41 = vadd.f32 %v294_v37, %v286_v28  ;;  %v302_v43 = vadd.f32 %v301_v38, %v287_v29 }
  0x94   :  { %v296_v48 = vadd.f32 %v295_v41, %v288_v33  ;;  %v303_v53 = vadd.f32 %v302_v43, %v289_v40 }
  0x96   :  { %v304_v54 = vadd.f32 %v303_v53, %v296_v48 }
  0x98   :  { %305 = vadd.xlane.f32.xlu0 %v304_v54 }
 0x125   :  { %v306_v2 = vpop.xlane.xlu0 %305 }
 0x126   :  { %308 = vst.msk [vmem:[%s640_s3] sm:$0xff] %vm307_vm0, %v306_v2 }

// kernel: perceptual_loss.9
= control target key start
LH: loop header
LB: loop body
LE: loop exit
PB: predicated region body
PF: predicated region fallthrough
CT: control target
= control target key end

     0   :  { %s602_s12 = smov 0   ;;  %s604_s13 = smov 0   ;;  %s675_s0 = inlined_call_operand.vmem [shape: bf16[16,72], index: 0, kind: input, shape index: {}]   ;;  %s676_s1 = inlined_call_operand.vmem [shape: bf16[72,512], index: 1, kind: input, shape index: {}]   ;;  %s677_s2 = inlined_call_operand.vmem [shape: f32[16,1], index: 2, kind: input, shape index: {}]   ;;  %s678_s3 = inlined_call_operand.vmem [shape: bf16[16,512], index: 3, kind: output, shape index: {}]  }
   0x1   :  { %s606_s14 = smov 0  }
   0x2 LB: > { %s482_s15 = sadd.s32 4294967295, %s579_s14   ;;  %s619_s16 = sadd.s32 1, %s579_s14   ;;  %s579_s14 = sphi %s606_s14, %s682_s14   ;;  %s575_s13 = sphi %s604_s13, %s681_s13   ;;  %s571_s12 = sphi %s602_s12, %s680_s12  }
   0x3   : > { %s38_s17 = ssub.s32 %s579_s14, %s619_s16  ;;  %s41_s18 = sadd.s32 1, %s575_s13 }
   0x4   : > { %p39_p0 = scmp.eq.s32.totalorder %s38_s17, 0  ;;  %p48_p1 = scmp.ne.s32.totalorder %s575_s13, %s571_s12 }
   0x5   : > { %p49_p2 = scmp.eq.s32.totalorder %s579_s14, 0  ;;  %p99_p3 = scmp.eq.s32.totalorder %s482_s15, 1 }
   0x6   : > { %s630_s19 = scalar_select %p39_p0, %s575_s13, %s41_s18  }
   0x7   : > { %p50_p4 = por %p49_p2, %p48_p1  ;;  %p632_p5 = por %p99_p3, %p48_p1 }
   0x8   : > { %p485_p6 = scmp.ge.s32.totalorder %s579_s14, 2 }
   0xa   : > { %127 = sbr.rel (%p485_p6) target bundleno = 26 (0x1a), region = 24 }
  0x11   : > { %130 = sbr.rel (!%p50_p4) target bundleno = 26 (0x1a), region = 28  ;;  %s132_s21 = sand.u32 (%p50_p4), 1, %s575_s13  }
  0x12   : > { %s510_s22 = sshll.u32 (%p50_p4), %s579_s14, 3  ;;  %s514_s23 = smul.u32 (%p50_p4), 72, %s132_s21 }
  0x13   : > { %s137_s26 = scalar_lea.vmem (%p50_p4), %s676_s1, %s510_s22 }
  0x14   : > { %v181_v0 = vld [vmem:[%s137_s26] sm:$0xff] (%p50_p4)  ;;  %v183_v1 = vld [vmem:[%s137_s26 + $0x10] sm:$0xff] (%p50_p4)  ;;  %s134_s27 = scalar_lea.vmem (%p50_p4), [#allocation2], %s514_s23 }
  0x15   : > { %v185_v2 = vld [vmem:[%s137_s26 + $0x20] sm:$0xff] (%p50_p4)  ;;  %v187_v3 = vld [vmem:[%s137_s26 + $0x30] sm:$0xff] (%p50_p4)  ;;  %182 = vst [vmem:[%s134_s27] sm:$0xff] (%p50_p4), %v181_v0  ;;  %184 = vst [vmem:[%s134_s27 + $0x8] sm:$0xff] (%p50_p4), %v183_v1 }
  0x16   : > { %v189_v4 = vld [vmem:[%s137_s26 + $0x40] sm:$0xff] (%p50_p4)  ;;  %v191_v5 = vld [vmem:[%s137_s26 + $0x50] sm:$0xff] (%p50_p4)  ;;  %186 = vst [vmem:[%s134_s27 + $0x10] sm:$0xff] (%p50_p4), %v185_v2  ;;  %188 = vst [vmem:[%s134_s27 + $0x18] sm:$0xff] (%p50_p4), %v187_v3 }
  0x17   : > { %190 = vst [vmem:[%s134_s27 + $0x20] sm:$0xff] (%p50_p4), %v189_v4  ;;  %192 = vst [vmem:[%s134_s27 + $0x28] sm:$0xff] (%p50_p4), %v191_v5  ;;  %v193_v6 = vld [vmem:[%s137_s26 + $0x60] sm:$0xff] (%p50_p4)  ;;  %v195_v7 = vld [vmem:[%s137_s26 + $0x70] sm:$0xff] (%p50_p4) }
  0x18   : > { %v197_v8 = vld [vmem:[%s137_s26 + $0x80] sm:$0xff]  ;;  %194 = vst [vmem:[%s134_s27 + $0x30] sm:$0xff] %v193_v6  ;;  %196 = vst [vmem:[%s134_s27 + $0x38] sm:$0xff] %v195_v7 }
  0x19   : > { %198 = vst [vmem:[%s134_s27 + $0x40] sm:$0xff] %v197_v8 }
  0x1a PF: > { %p488_p7 = scmp.ge.s32.totalorder %s579_s14, 1  ;;  %p203_p8 = scmp.lt.s32.totalorder %s579_s14, 3 }
  0x1c   : > { %p204_p9 = pnand %p488_p7, %p203_p8 }
  0x1d   : > { %s210_s28 = sand.u32 (!%p204_p9), 1, %s571_s12   ;;  %v581_v9 = vmov (!%p204_p9), 0   ;;  %v246_v10 = vld [vmem:[%s677_s2] sm:$0xff] (!%p204_p9)  ;;  %v247_v11 = vld [vmem:[%s677_s2 + $0x8] sm:$0xff] (!%p204_p9)  ;;  %vm312_vm0 = vcmask (!%p204_p9), 1043456   ;;  %vm308_vm1 = vcmask (!%p204_p9), 588800  }
  0x1e   : > { %207 = sbr.rel (%p204_p9) target bundleno = 285 (0x11d), region = 66  ;;  %351 = vmatprep.mubr.bf16.mxu0 (!%p204_p9), %v581_v9  ;;  %541 = vset.pattern.permute.xlu0 (!%p204_p9), %v581_v9  ;;  %v556_v24 = vld [vmem:[%s675_s0] sm:$0xff] (!%p204_p9)   ;;  %s489_s10 = sshll.u32 (!%p204_p9), %s210_s28, 4 }
  0x1f   : > { %s515_s29 = smul.u32 (!%p204_p9), 72, %s210_s28  ;;  %250 = vperm.xlu0 (!%p204_p9), %541, %v246_v10   ;;  %s231_s11 = scalar_lea.vmem (!%p204_p9), [#allocation3], %s489_s10 }
  0x21   : > { %s212_s7 = scalar_lea.vmem (!%p204_p9), [#allocation2], %s515_s29 }
  0x22   : > { %v542_v12 = vld [vmem:[%s212_s7 + $0x4] ss:$8 sps:$4 sm:$0xff] (!%p204_p9)   ;;  %v544_v13 = vld [vmem:[%s212_s7] ss:$8 sps:$4 sm:$0xff] (!%p204_p9)   ;;  %v545_v14 = vld [vmem:[%s212_s7 + $0x14] ss:$8 sps:$4 sm:$0xff] (!%p204_p9)  }
  0x23   : > { %319 = vmatprep.subr.bf16.mxu0 (!%p204_p9), %v542_v12  ;;  %255 = vperm.xlu0 (!%p204_p9), %541, %v247_v11   ;;  %v547_v15 = vld [vmem:[%s212_s7 + $0x10] ss:$8 sps:$4 sm:$0xff] (!%p204_p9)   ;;  %v548_v16 = vld [vmem:[%s212_s7 + $0x24] ss:$8 sps:$4 sm:$0xff] (!%p204_p9)   ;;  %v550_v17 = vld [vmem:[%s212_s7 + $0x20] ss:$8 sps:$4 sm:$0xff] (!%p204_p9)  }
  0x24   : > { %320 = vmatpush1.bf16.msra.mxu0 (!%p204_p9), %v544_v13  ;;  %v551_v18 = vld [vmem:[%s212_s7 + $0x34] ss:$8 sps:$4 sm:$0xff] (!%p204_p9)   ;;  %v245_v19 = vld [vmem:[%s212_s7 + $0x40] sm:$0xff] (!%p204_p9)  ;;  %v553_v20 = vld [vmem:[%s212_s7 + $0x30] ss:$8 sps:$4 sm:$0xff] (!%p204_p9)  }
  0x25   : > { %321 = vmatprep.subr.bf16.mxu0 %v545_v14  ;;  %v500_v21 = vcombine.high %v245_v19, %v245_v19  ;;  %v499_v22 = vcombine.low %v245_v19, %v245_v19  ;;  %s513_s12 = sshll.u32 (%p632_p5), %s482_s15, 3 }
  0x26   : > { %s389_s21 = scalar_lea.vmem (%p632_p5), %s678_s3, %s513_s12 }
  0x27   : > { %v314_v23 = vsel %vm312_vm0, %v499_v22, 0 }
  0x28   : > { %322 = vmatpush1.bf16.msra.mxu0 %v547_v15 }
  0x29   : > { %323 = vmatprep.subr.bf16.mxu0 %v548_v16 }
  0x2c   : > { %324 = vmatpush1.bf16.msra.mxu0 %v550_v17 }
  0x2d   : > { %325 = vmatprep.subr.bf16.mxu0 %v551_v18 }
  0x30   : > { %326 = vmatpush1.bf16.msra.mxu0 %v553_v20 }
  0x31   : > { %501 = vmatprep.subr.msk.bf16.mxu0 %vm312_vm0, %v500_v21 }
  0x34   : > { %328 = vmatpush1.bf16.msra.mxu0 %v314_v23 }
  0x37   : > { %502 = vmatmul.mubr.msk.bf16.vlgmr.msra.gmra.mrb[0].mxu0 %vm308_vm1, %v556_v24 }
  0x9e   : > { %v251_v25 = vpop.permute.xlu0 %250 }
  0xa2   : > { %v256_v29 = vpop.permute.xlu0 %255 }
 0x10a   : > { %v353_v26 = vpop.f32.mrb[0].mxu0 }
 0x10b   : > { %v354_v27 = vadd.f32 %v353_v26, %v251_v25  ;;  %v355_v28 = vpop.f32.mrb[1].mxu0 }
 0x10c   : > { %v356_v30 = vadd.f32 %v355_v28, %v251_v25  ;;  %v357_v31 = vpop.f32.mrb[2].mxu0 }
 0x10d   : > { %v362_v32 = vmax.f32 %v354_v27, 0.0  ;;  %v358_v33 = vadd.f32 %v357_v31, %v256_v29  ;;  %v359_v34 = vpop.f32.mrb[3].mxu0 }
 0x10e   : > { %v363_v35 = vmax.f32 %v356_v30, 0.0  ;;  %v360_v36 = vadd.f32 %v359_v34, %v256_v29  ;;  %386 = sbr.rel (!%p632_p5) target bundleno = 285 (0x11d), region = 74 }
 0x10f   : > { %v364_v37 = vmax.f32 %v358_v33, 0.0 }
 0x110   : > { %v511_v38 = vpack.c.bf16 %v363_v35, %v362_v32  ;;  %v365_v39 = vmax.f32 %v360_v36, 0.0 }
 0x112   : > { %378 = vst [vmem:[%s231_s11] sm:$0xff] %v511_v38  ;;  %v512_v40 = vpack.c.bf16 %v365_v39, %v364_v37 }
 0x114   : > { %379 = vst [vmem:[%s231_s11 + $0x8] sm:$0xff] %v512_v40 }
 0x119   : > { %v419_v41 = vld [vmem:[%s231_s11] sm:$0xff] }
 0x11a   : > { %420 = vst [vmem:[%s389_s21] sm:$0xff] %v419_v41 }
 0x11b   : > { %v421_v42 = vld [vmem:[%s231_s11 + $0x8] sm:$0xff] }
 0x11c   : > { %422 = vst [vmem:[%s389_s21 + $0x10] sm:$0xff] %v421_v42 }
 0x11d PF: > { %p10_p10 = scmp.ge.s32.totalorder %s619_s16, 4   ;;  %s680_s12 = smov %s575_s13 }
 0x11e   : > { %s681_s13 = smov %s630_s19  ;;  %s682_s14 = smov %s619_s16 }
 0x11f   :  { %12 = sbr.rel (!%p10_p10) target bundleno = 2 (0x2), region = 143 }

// kernel: perceptual_loss.12
= control target key start
LH: loop header
LB: loop body
LE: loop exit
PB: predicated region body
PF: predicated region fallthrough
CT: control target
= control target key end

     0   :  { %v508_v0 = vmov 0   ;;  %vm401_vm0 = vcmask 7168   ;;  %s824_s2 = inlined_call_operand.vmem [shape: f32[16,1,1], index: 2, kind: input, shape index: {}]   ;;  %s825_s0 = inlined_call_operand.vmem [shape: bf16[16,8,128], index: 0, kind: input, shape index: {}]   ;;  %s826_s1 = inlined_call_operand.vmem [shape: bf16[16,8,128], index: 1, kind: input, shape index: {}]   ;;  %s827_s3 = inlined_call_operand.vmem [shape: f32[8,1], index: 3, kind: output, shape index: {}]  }
   0x1   :  { %503 = vset.pattern.permute.xlu1 %v508_v0  ;;  %502 = vset.pattern.permute.xlu0 %v508_v0  ;;  %v409_v1 = vld [vmem:[%s824_s2 + $0x2] ss:$0 sm:$0xff]  ;;  %v407_v2 = vld [vmem:[%s824_s2] ss:$0 sm:$0xff]  ;;  %v410_v3 = vld [vmem:[%s824_s2 + $0x3] ss:$0 sm:$0xff] }
   0x2   :  { %313 = vperm.xlu1 %503, %v409_v1   ;;  %305 = vperm.xlu0 %502, %v407_v2   ;;  %v408_v4 = vld [vmem:[%s824_s2 + $0x1] ss:$0 sm:$0xff]  ;;  %v412_v5 = vld [vmem:[%s824_s2 + $0x5] ss:$0 sm:$0xff]  ;;  %v411_v6 = vld [vmem:[%s824_s2 + $0x4] ss:$0 sm:$0xff] }
   0x3   :  { %v414_v7 = vld [vmem:[%s824_s2 + $0x7] ss:$0 sm:$0xff]  ;;  %v413_v8 = vld [vmem:[%s824_s2 + $0x6] ss:$0 sm:$0xff]  ;;  %v416_v9 = vld [vmem:[%s824_s2 + $0x9] ss:$0 sm:$0xff] }
   0x4   :  { %v415_v10 = vld [vmem:[%s824_s2 + $0x8] ss:$0 sm:$0xff]  ;;  %v418_v11 = vld [vmem:[%s824_s2 + $0xb] ss:$0 sm:$0xff]  ;;  %v417_v12 = vld [vmem:[%s824_s2 + $0xa] ss:$0 sm:$0xff] }
   0x5   :  { %v420_v13 = vld [vmem:[%s824_s2 + $0xd] ss:$0 sm:$0xff]  ;;  %v419_v14 = vld [vmem:[%s824_s2 + $0xc] ss:$0 sm:$0xff]  ;;  %v422_v15 = vld [vmem:[%s824_s2 + $0xf] ss:$0 sm:$0xff] }
   0x6   :  { %317 = vperm.xlu1 %503, %v410_v3   ;;  %309 = vperm.xlu0 %502, %v408_v4   ;;  %v421_v16 = vld [vmem:[%s824_s2 + $0xe] ss:$0 sm:$0xff]  ;;  %v424_v17 = vld [vmem:[%s825_s0] sm:$0xff]   ;;  %v488_v34 = vld [vmem:[%s825_s0 + $0x10] sm:$0xff]  }
   0x7   :  { %v456_v18 = vld [vmem:[%s826_s1] sm:$0xff]   ;;  %v583_v19 = vunpack.c.l.bf16 %v424_v17  ;;  %v585_v20 = vunpack.c.h.bf16 %v424_v17  ;;  %v487_v21 = vld [vmem:[%s825_s0 + $0x8] sm:$0xff]   ;;  %v495_v38 = vld [vmem:[%s826_s1 + $0x10] sm:$0xff]   ;;  %v623_v39 = vunpack.c.l.bf16 %v488_v34  ;;  %v631_v45 = vunpack.c.h.bf16 %v488_v34 }
   0x8   :  { %v590_v22 = vunpack.c.l.bf16 %v456_v18  ;;  %v592_v23 = vunpack.c.h.bf16 %v456_v18  ;;  %v494_v24 = vld [vmem:[%s826_s1 + $0x8] sm:$0xff]   ;;  %v597_v25 = vunpack.c.l.bf16 %v487_v21  ;;  %v609_v31 = vunpack.c.h.bf16 %v487_v21  ;;  %v489_v48 = vld [vmem:[%s825_s0 + $0x18] sm:$0xff]   ;;  %v490_v62 = vld [vmem:[%s825_s0 + $0x20] sm:$0xff]  }
   0x9   :  { %v78_v26 = vmul.f32 %v583_v19, %v583_v19  ;;  %v79_v27 = vmul.f32 %v585_v20, %v585_v20  ;;  %v603_v28 = vunpack.c.l.bf16 %v494_v24  ;;  %v616_v35 = vunpack.c.h.bf16 %v494_v24  ;;  %v496_v52 = vld [vmem:[%s826_s1 + $0x18] sm:$0xff]   ;;  %v497_v2 = vld [vmem:[%s826_s1 + $0x20] sm:$0xff]  }
   0xa   :  { %325 = vperm.xlu1 %503, %v412_v5   ;;  %321 = vperm.xlu0 %502, %v411_v6   ;;  %v111_v29 = vmul.f32 %v590_v22, %v590_v22  ;;  %v112_v30 = vmul.f32 %v592_v23, %v592_v23  ;;  %v80_v32 = vmul.f32 %v597_v25, %v597_v25  ;;  %v627_v42 = vunpack.c.l.bf16 %v495_v38 }
   0xb   :  { %v94_v33 = vadd.f32 %v79_v27, %v78_v26  ;;  %v113_v36 = vmul.f32 %v603_v28, %v603_v28  ;;  %v81_v40 = vmul.f32 %v609_v31, %v609_v31  ;;  %v114_v43 = vmul.f32 %v616_v35, %v616_v35 }
   0xc   :  { %v127_v37 = vadd.f32 %v112_v30, %v111_v29  ;;  %v82_v46 = vmul.f32 %v623_v39, %v623_v39  ;;  %v638_v49 = vunpack.c.h.bf16 %v495_v38  ;;  %v115_v50 = vmul.f32 %v627_v42, %v627_v42  ;;  %v499_v38 = vld [vmem:[%s826_s1 + $0x30] sm:$0xff]  }
   0xd   :  { %v95_v41 = vadd.f32 %v94_v33, %v80_v32  ;;  %v645_v53 = vunpack.c.l.bf16 %v489_v48  ;;  %v83_v54 = vmul.f32 %v631_v45, %v631_v45  ;;  %v649_v56 = vunpack.c.l.bf16 %v496_v52  ;;  %v492_v33 = vld [vmem:[%s825_s0 + $0x30] sm:$0xff]  }
   0xe   :  { %333 = vperm.xlu1 %503, %v414_v7   ;;  %329 = vperm.xlu0 %502, %v413_v8   ;;  %v128_v44 = vadd.f32 %v127_v37, %v113_v36  ;;  %v116_v57 = vmul.f32 %v638_v49, %v638_v49  ;;  %v653_v59 = vunpack.c.h.bf16 %v489_v48  ;;  %v660_v63 = vunpack.c.h.bf16 %v496_v52  ;;  %v493_v52 = vld [vmem:[%s825_s0 + $0x38] sm:$0xff]  }
   0xf   :  { %v96_v47 = vadd.f32 %v95_v41, %v81_v40  ;;  %v84_v60 = vmul.f32 %v645_v53, %v645_v53  ;;  %v117_v0 = vmul.f32 %v649_v56, %v649_v56  ;;  %v667_v3 = vunpack.c.l.bf16 %v490_v62 }
  0x10   :  { %v129_v51 = vadd.f32 %v128_v44, %v114_v43  ;;  %v85_v4 = vmul.f32 %v653_v59, %v653_v59  ;;  %v671_v6 = vunpack.c.l.bf16 %v497_v2  ;;  %v118_v7 = vmul.f32 %v660_v63, %v660_v63 }
  0x11   :  { %v97_v55 = vadd.f32 %v96_v47, %v82_v46  ;;  %v711_v40 = vunpack.c.l.bf16 %v492_v33  ;;  %v715_v44 = vunpack.c.l.bf16 %v499_v38  ;;  %v719_v48 = vunpack.c.h.bf16 %v492_v33 }
  0x12   :  { %341 = vperm.xlu1 %503, %v416_v9   ;;  %337 = vperm.xlu0 %502, %v415_v10   ;;  %v130_v58 = vadd.f32 %v129_v51, %v115_v50  ;;  %v675_v9 = vunpack.c.h.bf16 %v490_v62  ;;  %v86_v10 = vmul.f32 %v667_v3, %v667_v3 }
  0x13   :  { %v98_v61 = vadd.f32 %v97_v55, %v83_v54  ;;  %v90_v50 = vmul.f32 %v711_v40, %v711_v40  ;;  %v726_v54 = vunpack.c.h.bf16 %v499_v38  ;;  %v123_v55 = vmul.f32 %v715_v44, %v715_v44 }
  0x14   :  { %v131_v1 = vadd.f32 %v130_v58, %v116_v57  ;;  %v87_v18 = vmul.f32 %v675_v9, %v675_v9  ;;  %v500_v58 = vld [vmem:[%s826_s1 + $0x38] sm:$0xff]  }
  0x15   :  { %v99_v5 = vadd.f32 %v98_v61, %v84_v60  ;;  %v733_v60 = vunpack.c.l.bf16 %v493_v52  ;;  %v91_v61 = vmul.f32 %v719_v48, %v719_v48 }
  0x16   :  { %349 = vperm.xlu1 %503, %v418_v11   ;;  %345 = vperm.xlu0 %502, %v417_v12   ;;  %v132_v8 = vadd.f32 %v131_v1, %v117_v0  ;;  %v491_v12 = vld [vmem:[%s825_s0 + $0x28] sm:$0xff]   ;;  %v737_v0 = vunpack.c.l.bf16 %v500_v58  ;;  %v124_v1 = vmul.f32 %v726_v54, %v726_v54 }
  0x17   :  { %v100_v11 = vadd.f32 %v99_v5, %v85_v4  ;;  %v689_v17 = vunpack.c.l.bf16 %v491_v12  ;;  %v697_v29 = vunpack.c.h.bf16 %v491_v12  ;;  %v741_v4 = vunpack.c.h.bf16 %v493_v52 }
  0x18   :  { %v92_v5 = vmul.f32 %v733_v60, %v733_v60 }
  0x19   :  { %v101_v21 = vadd.f32 %v100_v11, %v86_v10  ;;  %v88_v30 = vmul.f32 %v689_v17, %v689_v17  ;;  %v89_v41 = vmul.f32 %v697_v29, %v697_v29  ;;  %v125_v10 = vmul.f32 %v737_v0, %v737_v0 }
  0x1a   :  { %357 = vperm.xlu1 %503, %v420_v13   ;;  %353 = vperm.xlu0 %502, %v419_v14   ;;  %v682_v13 = vunpack.c.h.bf16 %v497_v2  ;;  %v119_v14 = vmul.f32 %v671_v6, %v671_v6  ;;  %v93_v12 = vmul.f32 %v741_v4, %v741_v4 }
  0x1b   :  { %v102_v32 = vadd.f32 %v101_v21, %v87_v18 }
  0x1c   :  { %v120_v26 = vmul.f32 %v682_v13, %v682_v13 }
  0x1d   :  { %v103_v43 = vadd.f32 %v102_v32, %v88_v30 }
  0x1e   :  { %365 = vperm.xlu1 %503, %v422_v15   ;;  %361 = vperm.xlu0 %502, %v421_v16   ;;  %v133_v15 = vadd.f32 %v132_v8, %v118_v7  ;;  %v498_v16 = vld [vmem:[%s826_s1 + $0x28] sm:$0xff]   ;;  %v745_v8 = vunpack.c.h.bf16 %v500_v58 }
  0x1f   :  { %v693_v24 = vunpack.c.l.bf16 %v498_v16  ;;  %v704_v34 = vunpack.c.h.bf16 %v498_v16  ;;  %v104_v51 = vadd.f32 %v103_v43, %v89_v41 }
  0x20   :  { %v134_v27 = vadd.f32 %v133_v15, %v119_v14  ;;  %v126_v15 = vmul.f32 %v745_v8, %v745_v8 }
  0x21   :  { %v121_v36 = vmul.f32 %v693_v24, %v693_v24  ;;  %v122_v46 = vmul.f32 %v704_v34, %v704_v34  ;;  %v105_v62 = vadd.f32 %v104_v51, %v90_v50 }
  0x22   :  { %v135_v37 = vadd.f32 %v134_v27, %v120_v26 }
  0x23   :  { %v106_v7 = vadd.f32 %v105_v62, %v91_v61 }
  0x24   :  { %v136_v47 = vadd.f32 %v135_v37, %v121_v36 }
  0x25   :  { %v107_v14 = vadd.f32 %v106_v7, %v92_v5 }
  0x26   :  { %v137_v57 = vadd.f32 %v136_v47, %v122_v46 }
  0x27   :  { %v108_v18 = vadd.f32 %v107_v14, %v93_v12 }
  0x28   :  { %v138_v2 = vadd.f32 %v137_v57, %v123_v55 }
  0x29   :  { %v109_v26 = vadd.f32 1e-20, %v108_v18 }
  0x2a   :  { %v139_v11 = vadd.f32 %v138_v2, %v124_v1 }
  0x2b   :  { %504 = vrsqrt.f32 %v109_v26 }
  0x2c   :  { %v140_v16 = vadd.f32 %v139_v11, %v125_v10 }
  0x2e   :  { %v141_v21 = vadd.f32 %v140_v16, %v126_v15 }
  0x30   :  { %v142_v27 = vadd.f32 1e-20, %v141_v21 }
  0x32   :  { %506 = vrsqrt.f32 %v142_v27 }
  0x35   :  { %v753_v30 = vpop.eup %504 }
  0x36   :  { %v144_v33 = vmul.f32 %v753_v30, %v583_v19  ;;  %v145_v37 = vmul.f32 %v753_v30, %v585_v20  ;;  %v146_v41 = vmul.f32 %v753_v30, %v597_v25  ;;  %v147_v47 = vmul.f32 %v753_v30, %v609_v31 }
  0x37   :  { %v148_v20 = vmul.f32 %v753_v30, %v623_v39  ;;  %v151_v1 = vmul.f32 %v753_v30, %v653_v59 }
  0x3c   :  { %v755_v32 = vpop.eup %506 }
  0x3d   :  { %v160_v36 = vmul.f32 %v755_v32, %v590_v22  ;;  %v161_v38 = vmul.f32 %v755_v32, %v592_v23  ;;  %v162_v43 = vmul.f32 %v755_v32, %v603_v28  ;;  %v163_v19 = vmul.f32 %v755_v32, %v616_v35 }
  0x3e   :  { %v164_v23 = vmul.f32 %v755_v32, %v627_v42  ;;  %v149_v28 = vmul.f32 %v753_v30, %v631_v45  ;;  %v165_v31 = vmul.f32 %v755_v32, %v638_v49  ;;  %v150_v35 = vmul.f32 %v753_v30, %v645_v53 }
  0x3f   :  { %v176_v46 = vsub.f32 %v144_v33, %v160_v36  ;;  %v177_v22 = vsub.f32 %v145_v37, %v161_v38  ;;  %v178_v50 = vsub.f32 %v146_v41, %v162_v43  ;;  %v179_v55 = vsub.f32 %v147_v47, %v163_v19 }
  0x40   :  { %v166_v39 = vmul.f32 %v755_v32, %v649_v56  ;;  %v180_v61 = vsub.f32 %v148_v20, %v164_v23  ;;  %v167_v45 = vmul.f32 %v755_v32, %v660_v63  ;;  %v181_v49 = vsub.f32 %v149_v28, %v165_v31 }
  0x41   :  { %v192_v52 = vmul.f32 %v176_v46, %v176_v46  ;;  %v193_v57 = vmul.f32 %v177_v22, %v177_v22  ;;  %v194_v58 = vmul.f32 %v178_v50, %v178_v50  ;;  %v195_v5 = vmul.f32 %v179_v55, %v179_v55 }
  0x42   :  { %v182_v10 = vsub.f32 %v150_v35, %v166_v39  ;;  %v152_v53 = vmul.f32 %v753_v30, %v667_v3  ;;  %v196_v12 = vmul.f32 %v180_v61, %v180_v61  ;;  %v168_v14 = vmul.f32 %v755_v32, %v671_v6 }
  0x43   :  { %v183_v59 = vsub.f32 %v151_v1, %v167_v45  ;;  %v153_v63 = vmul.f32 %v753_v30, %v675_v9  ;;  %v197_v26 = vmul.f32 %v181_v49, %v181_v49  ;;  %v169_v27 = vmul.f32 %v755_v32, %v682_v13 }
  0x44   :  { %v198_v33 = vmul.f32 %v182_v10, %v182_v10  ;;  %v154_v3 = vmul.f32 %v753_v30, %v689_v17  ;;  %v184_v38 = vsub.f32 %v152_v53, %v168_v14  ;;  %v170_v6 = vmul.f32 %v755_v32, %v693_v24 }
  0x45   :  { %v199_v43 = vmul.f32 %v183_v59, %v183_v59  ;;  %v155_v9 = vmul.f32 %v753_v30, %v697_v29  ;;  %v185_v22 = vsub.f32 %v153_v63, %v169_v27  ;;  %v171_v13 = vmul.f32 %v755_v32, %v704_v34 }
  0x46   :  { %v156_v17 = vmul.f32 %v753_v30, %v711_v40  ;;  %v172_v50 = vmul.f32 %v755_v32, %v715_v44  ;;  %v200_v23 = vmul.f32 %v184_v38, %v184_v38  ;;  %v157_v29 = vmul.f32 %v753_v30, %v719_v48 }
  0x47   :  { %v187_v31 = vsub.f32 %v155_v9, %v171_v13  ;;  %v158_v40 = vmul.f32 %v753_v30, %v733_v60  ;;  %v174_v44 = vmul.f32 %v755_v32, %v737_v0  ;;  %v159_v48 = vmul.f32 %v753_v30, %v741_v4 }
  0x48   :  { %v188_v61 = vsub.f32 %v156_v17, %v172_v50 }
  0x49   :  { %v190_v0 = vsub.f32 %v158_v40, %v174_v44 }
  0x4a   :  { %v204_v49 = vmul.f32 %v188_v61, %v188_v61 }
  0x4b   :  { %v206_v4 = vmul.f32 %v190_v0, %v190_v0 }
  0x81   :  { %v314_v51 = vpop.permute.xlu1 %313  ;;  %v306_v25 = vpop.permute.xlu0 %305 }
  0x82   :  { %v368_v2 = vmul.f32 %v306_v25, %v192_v52  ;;  %v370_v11 = vmul.f32 %v314_v51, %v194_v58  ;;  %v186_v51 = vsub.f32 %v154_v3, %v170_v6  ;;  %v173_v52 = vmul.f32 %v755_v32, %v726_v54 }
  0x83   :  { %v175_v54 = vmul.f32 %v755_v32, %v745_v8 }
  0x84   :  { %v202_v58 = vmul.f32 %v186_v51, %v186_v51 }
  0x85   :  { %v318_v42 = vpop.permute.xlu1 %317  ;;  %v310_v62 = vpop.permute.xlu0 %309  ;;  %v191_v14 = vsub.f32 %v159_v48, %v175_v54 }
  0x86   :  { %v369_v7 = vmul.f32 %v310_v62, %v193_v57  ;;  %v371_v18 = vmul.f32 %v318_v42, %v195_v5  ;;  %v201_v57 = vmul.f32 %v185_v22, %v185_v22  ;;  %v189_v5 = vsub.f32 %v157_v29, %v173_v52 }
  0x87   :  { %v207_v32 = vmul.f32 %v191_v14, %v191_v14 }
  0x88   :  { %v384_v56 = vadd.f32 %v369_v7, %v368_v2  ;;  %v203_v2 = vmul.f32 %v187_v31, %v187_v31 }
  0x89   :  { %v326_v15 = vpop.permute.xlu1 %325  ;;  %v322_v16 = vpop.permute.xlu0 %321 }
  0x8a   :  { %v385_v21 = vadd.f32 %v384_v56, %v370_v11  ;;  %v372_v36 = vmul.f32 %v322_v16, %v196_v12  ;;  %v373_v47 = vmul.f32 %v326_v15, %v197_v26  ;;  %v205_v12 = vmul.f32 %v189_v5, %v189_v5 }
  0x8c   :  { %v386_v37 = vadd.f32 %v385_v21, %v371_v18 }
  0x8d   :  { %v334_v41 = vpop.permute.xlu1 %333  ;;  %v330_v46 = vpop.permute.xlu0 %329 }
  0x8e   :  { %v387_v19 = vadd.f32 %v386_v37, %v372_v36  ;;  %v374_v20 = vmul.f32 %v330_v46, %v198_v33  ;;  %v375_v55 = vmul.f32 %v334_v41, %v199_v43 }
  0x90   :  { %v388_v24 = vadd.f32 %v387_v19, %v373_v47 }
  0x91   :  { %v342_v25 = vpop.permute.xlu1 %341  ;;  %v338_v28 = vpop.permute.xlu0 %337 }
  0x92   :  { %v389_v34 = vadd.f32 %v388_v24, %v374_v20  ;;  %v376_v35 = vmul.f32 %v338_v28, %v200_v23  ;;  %v377_v1 = vmul.f32 %v342_v25, %v201_v57 }
  0x94   :  { %v390_v39 = vadd.f32 %v389_v34, %v375_v55 }
  0x95   :  { %v350_v42 = vpop.permute.xlu1 %349  ;;  %v346_v62 = vpop.permute.xlu0 %345 }
  0x96   :  { %v391_v45 = vadd.f32 %v390_v39, %v376_v35  ;;  %v378_v60 = vmul.f32 %v346_v62, %v202_v58  ;;  %v379_v11 = vmul.f32 %v350_v42, %v203_v2 }
  0x98   :  { %v392_v7 = vadd.f32 %v391_v45, %v377_v1 }
  0x99   :  { %v358_v10 = vpop.permute.xlu1 %357  ;;  %v354_v53 = vpop.permute.xlu0 %353 }
  0x9a   :  { %v393_v56 = vadd.f32 %v392_v7, %v378_v60  ;;  %v380_v15 = vmul.f32 %v354_v53, %v204_v49  ;;  %v381_v59 = vmul.f32 %v358_v10, %v205_v12 }
  0x9c   :  { %v394_v16 = vadd.f32 %v393_v56, %v379_v11 }
  0x9d   :  { %v362_v30 = vpop.permute.xlu0 %361  ;;  %v366_v63 = vpop.permute.xlu1 %365 }
  0x9e   :  { %v395_v8 = vadd.f32 %v394_v16, %v380_v15  ;;  %v382_v18 = vmul.f32 %v362_v30, %v206_v4  ;;  %v383_v26 = vmul.f32 %v366_v63, %v207_v32 }
  0xa0   :  { %v396_v21 = vadd.f32 %v395_v8, %v381_v59 }
  0xa2   :  { %v397_v27 = vadd.f32 %v396_v21, %v382_v18 }
  0xa4   :  { %v398_v33 = vadd.f32 %v397_v27, %v383_v26 }
  0xa6   :  { %399 = vadd.xlane.f32.xlu0 %v398_v33 }
 0x133   :  { %v400_v3 = vpop.xlane.xlu0 %399 }
 0x134   :  { %402 = vst.msk [vmem:[%s827_s3] sm:$0xff] %vm401_vm0, %v400_v3 }

// kernel: perceptual_loss.10
= control target key start
LH: loop header
LB: loop body
LE: loop exit
PB: predicated region body
PF: predicated region fallthrough
CT: control target
= control target key end

     0   :  { %v287_v0 = vmov 0   ;;  %vm133_vm0 = vcmask 130048   ;;  %s365_s1 = inlined_call_operand.vmem [shape: bf16[144,128], index: 1, kind: input, shape index: {}]   ;;  %s366_s0 = inlined_call_operand.vmem [shape: bf16[32,144], index: 0, kind: input, shape index: {}]   ;;  %s367_s2 = inlined_call_operand.vmem [shape: f32[32,1], index: 2, kind: input, shape index: {}]   ;;  %s368_s3 = inlined_call_operand.vmem [shape: bf16[32,128], index: 3, kind: output, shape index: {}]  }
   0x1   :  { %140 = vmatprep.subr.bf16.mxu0 %v287_v0  ;;  %251 = vmatprep.subr.bf16.mxu1 %v287_v0  ;;  %v272_v1 = vld [vmem:[%s365_s1] sm:$0xff]   ;;  %v273_v2 = vld [vmem:[%s365_s1 + $0x8] sm:$0xff]   ;;  %v274_v3 = vld [vmem:[%s365_s1 + $0x10] sm:$0xff]  }
   0x2   :  { %271 = vset.pattern.permute.xlu1 %v287_v0  ;;  %270 = vset.pattern.permute.xlu0 %v287_v0  ;;  %v275_v4 = vld [vmem:[%s365_s1 + $0x18] sm:$0xff]   ;;  %v283_v5 = vld [vmem:[%s366_s0 + $0x4] ss:$8 sps:$4 sm:$0xff]   ;;  %v39_v7 = vld [vmem:[%s367_s2 + $0x10] sm:$0xff] }
   0x3   :  { %141 = vmatpush1.bf16.msra.mxu0 %v272_v1  ;;  %260 = vmatpush1.bf16.msra.mxu1 %v272_v1  ;;  %v286_v6 = vld [vmem:[%s366_s0 + $0x14] ss:$8 sps:$4 sm:$0xff]   ;;  %v37_v8 = vld [vmem:[%s367_s2] sm:$0xff]  ;;  %v38_v11 = vld [vmem:[%s367_s2 + $0x8] sm:$0xff] }
   0x4   :  { %142 = vmatprep.subr.bf16.mxu0 %v287_v0  ;;  %252 = vmatprep.subr.bf16.mxu1 %v287_v0  ;;  %v40_v9 = vld [vmem:[%s367_s2 + $0x18] sm:$0xff]  ;;  %v276_v10 = vld [vmem:[%s365_s1 + $0x20] sm:$0xff]   ;;  %v277_v12 = vld [vmem:[%s365_s1 + $0x28] sm:$0xff]  }
   0x5   :  { %230 = vmatprep.mubr.msk.bf16.mxu0 %vm133_vm0, %v283_v5  ;;  %53 = vperm.xlu1 %271, %v39_v7   ;;  %v278_v13 = vld [vmem:[%s365_s1 + $0x30] sm:$0xff]   ;;  %v279_v14 = vld [vmem:[%s365_s1 + $0x38] sm:$0xff]   ;;  %v280_v15 = vld [vmem:[%s365_s1 + $0x40] sm:$0xff]  }
   0x6   :  { %231 = vmatprep.mubr.msk.bf16.mxu1 %vm133_vm0, %v286_v6  ;;  %43 = vperm.xlu0 %270, %v37_v8   ;;  %v281_v16 = vld [vmem:[%s366_s0] ss:$8 sps:$4 sm:$0xff]   ;;  %v284_v17 = vld [vmem:[%s366_s0 + $0x10] ss:$8 sps:$4 sm:$0xff]  }
   0x7   :  { %143 = vmatpush1.bf16.msra.mxu0 %v273_v2  ;;  %261 = vmatpush1.bf16.msra.mxu1 %v273_v2 }
   0x8   :  { %144 = vmatprep.subr.bf16.mxu0 %v287_v0  ;;  %253 = vmatprep.subr.bf16.mxu1 %v287_v0 }
   0x9   :  { %58 = vperm.xlu1 %271, %v40_v9  }
   0xa   :  { %48 = vperm.xlu0 %270, %v38_v11  }
   0xb   :  { %145 = vmatpush1.bf16.msra.mxu0 %v274_v3  ;;  %262 = vmatpush1.bf16.msra.mxu1 %v274_v3 }
   0xc   :  { %146 = vmatprep.subr.bf16.mxu0 %v287_v0  ;;  %254 = vmatprep.subr.bf16.mxu1 %v287_v0 }
   0xf   :  { %147 = vmatpush1.bf16.msra.mxu0 %v275_v4  ;;  %263 = vmatpush1.bf16.msra.mxu1 %v275_v4 }
  0x10   :  { %148 = vmatprep.subr.bf16.mxu0 %v287_v0  ;;  %255 = vmatprep.subr.bf16.mxu1 %v287_v0 }
  0x13   :  { %149 = vmatpush1.bf16.msra.mxu0 %v276_v10  ;;  %264 = vmatpush1.bf16.msra.mxu1 %v276_v10 }
  0x14   :  { %150 = vmatprep.subr.bf16.mxu0 %v287_v0  ;;  %256 = vmatprep.subr.bf16.mxu1 %v287_v0 }
  0x17   :  { %151 = vmatpush1.bf16.msra.mxu0 %v277_v12  ;;  %265 = vmatpush1.bf16.msra.mxu1 %v277_v12 }
  0x18   :  { %152 = vmatprep.subr.bf16.mxu0 %v287_v0  ;;  %257 = vmatprep.subr.bf16.mxu1 %v287_v0 }
  0x1b   :  { %153 = vmatpush1.bf16.msra.mxu0 %v278_v13  ;;  %266 = vmatpush1.bf16.msra.mxu1 %v278_v13 }
  0x1c   :  { %154 = vmatprep.subr.bf16.mxu0 %v287_v0  ;;  %258 = vmatprep.subr.bf16.mxu1 %v287_v0 }
  0x1f   :  { %155 = vmatpush1.bf16.msra.mxu0 %v279_v14  ;;  %267 = vmatpush1.bf16.msra.mxu1 %v279_v14 }
  0x20   :  { %156 = vmatprep.subr.bf16.mxu0 %v287_v0  ;;  %259 = vmatprep.subr.bf16.mxu1 %v287_v0 }
  0x23   :  { %157 = vmatpush1.bf16.msra.mxu0 %v280_v15  ;;  %268 = vmatpush1.bf16.msra.mxu1 %v280_v15 }
  0x26   :  { %173 = vmatmul.mubr.bf16.vlgmr.msra.gmra.mrb[0].mxu0 %v281_v16  ;;  %181 = vmatmul.mubr.bf16.vlgmr.msra.gmra.mrb[0].mxu1 %v284_v17 }
  0x84   :  { %v54_v18 = vpop.permute.xlu1 %53 }
  0x85   :  { %v44_v19 = vpop.permute.xlu0 %43 }
  0x88   :  { %v59_v20 = vpop.permute.xlu1 %58 }
  0x89   :  { %v49_v21 = vpop.permute.xlu0 %48 }
  0xf9   :  { %v174_v22 = vpop.f32.mrb[0].mxu0  ;;  %v182_v23 = vpop.f32.mrb[0].mxu1 }
  0xfa   :  { %v175_v24 = vadd.f32 %v174_v22, %v44_v19  ;;  %v183_v25 = vadd.f32 %v182_v23, %v54_v18  ;;  %v176_v26 = vpop.f32.mrb[1].mxu0  ;;  %v184_v27 = vpop.f32.mrb[1].mxu1 }
  0xfb   :  { %v177_v28 = vpop.f32.mrb[2].mxu0  ;;  %v185_v29 = vpop.f32.mrb[2].mxu1 }
  0xfc   :  { %v178_v30 = vadd.f32 %v177_v28, %v49_v21  ;;  %v186_v31 = vadd.f32 %v185_v29, %v59_v20  ;;  %v179_v32 = vpop.f32.mrb[3].mxu0  ;;  %v187_v33 = vpop.f32.mrb[3].mxu1  ;;  %v189_v34 = vmax.f32 %v175_v24, 0.0  ;;  %v191_v35 = vmax.f32 %v183_v25, 0.0 }
  0xfe   :  { %v190_v36 = vmax.f32 %v178_v30, 0.0  ;;  %v192_v37 = vmax.f32 %v186_v31, 0.0 }
 0x100   :  { %v243_v38 = vpack.c.bf16 %v190_v36, %v189_v34  ;;  %v248_v39 = vpack.c.bf16 %v192_v37, %v191_v35 }
 0x102   :  { %244 = vst [vmem:[%s368_s3] sm:$0xff] %v243_v38   ;;  %250 = vst [vmem:[%s368_s3 + $0x8] sm:$0xff] %v248_v39  }

// kernel: perceptual_loss.13
= control target key start
LH: loop header
LB: loop body
LE: loop exit
PB: predicated region body
PF: predicated region fallthrough
CT: control target
= control target key end

     0   :  { %v988_v0 = vmov 0   ;;  %vm785_vm0 = vcmask 7168   ;;  %s1608_s2 = inlined_call_operand.vmem [shape: f32[32,1,1], index: 2, kind: input, shape index: {}]   ;;  %s1609_s0 = inlined_call_operand.vmem [shape: bf16[32,8,128], index: 0, kind: input, shape index: {}]   ;;  %s1610_s1 = inlined_call_operand.vmem [shape: bf16[32,8,128], index: 1, kind: input, shape index: {}]   ;;  %s1611_s3 = inlined_call_operand.vmem [shape: f32[8,1], index: 3, kind: output, shape index: {}]  }
   0x1   :  { %983 = vset.pattern.permute.xlu1 %v988_v0  ;;  %982 = vset.pattern.permute.xlu0 %v988_v0  ;;  %v793_v1 = vld [vmem:[%s1608_s2 + $0x2] ss:$0 sm:$0xff]  ;;  %v791_v2 = vld [vmem:[%s1608_s2] ss:$0 sm:$0xff]  ;;  %v794_v3 = vld [vmem:[%s1608_s2 + $0x3] ss:$0 sm:$0xff] }
   0x2   :  { %601 = vperm.xlu1 %983, %v793_v1   ;;  %593 = vperm.xlu0 %982, %v791_v2   ;;  %v792_v4 = vld [vmem:[%s1608_s2 + $0x1] ss:$0 sm:$0xff]  ;;  %v796_v5 = vld [vmem:[%s1608_s2 + $0x5] ss:$0 sm:$0xff]  ;;  %v795_v6 = vld [vmem:[%s1608_s2 + $0x4] ss:$0 sm:$0xff] }
   0x3   :  { %v798_v7 = vld [vmem:[%s1608_s2 + $0x7] ss:$0 sm:$0xff]  ;;  %v797_v8 = vld [vmem:[%s1608_s2 + $0x6] ss:$0 sm:$0xff]  ;;  %v800_v9 = vld [vmem:[%s1608_s2 + $0x9] ss:$0 sm:$0xff] }
   0x4   :  { %v799_v10 = vld [vmem:[%s1608_s2 + $0x8] ss:$0 sm:$0xff]  ;;  %v802_v11 = vld [vmem:[%s1608_s2 + $0xb] ss:$0 sm:$0xff]  ;;  %v801_v12 = vld [vmem:[%s1608_s2 + $0xa] ss:$0 sm:$0xff] }
   0x5   :  { %v804_v13 = vld [vmem:[%s1608_s2 + $0xd] ss:$0 sm:$0xff]  ;;  %v803_v14 = vld [vmem:[%s1608_s2 + $0xc] ss:$0 sm:$0xff]  ;;  %v824_v15 = vld [vmem:[%s1609_s0] sm:$0xff]  }
   0x6   :  { %605 = vperm.xlu1 %983, %v794_v3   ;;  %597 = vperm.xlu0 %982, %v792_v4   ;;  %v806_v16 = vld [vmem:[%s1608_s2 + $0xf] ss:$0 sm:$0xff]  ;;  %v805_v17 = vld [vmem:[%s1608_s2 + $0xe] ss:$0 sm:$0xff]  ;;  %v1063_v19 = vunpack.c.l.bf16 %v824_v15  ;;  %v1065_v20 = vunpack.c.h.bf16 %v824_v15  ;;  %v808_v21 = vld [vmem:[%s1608_s2 + $0x11] ss:$0 sm:$0xff] }
   0x7   :  { %v951_v18 = vld [vmem:[%s1609_s0 + $0x8] sm:$0xff]   ;;  %v807_v22 = vld [vmem:[%s1608_s2 + $0x10] ss:$0 sm:$0xff]  ;;  %v810_v28 = vld [vmem:[%s1608_s2 + $0x13] ss:$0 sm:$0xff] }
   0x8   :  { %v1073_v23 = vunpack.c.l.bf16 %v951_v18  ;;  %v952_v24 = vld [vmem:[%s1609_s0 + $0x10] sm:$0xff]   ;;  %v1078_v25 = vunpack.c.h.bf16 %v951_v18  ;;  %v142_v26 = vmul.f32 %v1063_v19, %v1063_v19  ;;  %v143_v27 = vmul.f32 %v1065_v20, %v1065_v20  ;;  %v953_v31 = vld [vmem:[%s1609_s0 + $0x18] sm:$0xff]   ;;  %v888_v33 = vld [vmem:[%s1610_s1] sm:$0xff]  }
   0x9   :  { %v809_v29 = vld [vmem:[%s1608_s2 + $0x12] ss:$0 sm:$0xff]  ;;  %v1090_v30 = vunpack.c.l.bf16 %v952_v24  ;;  %v1100_v34 = vunpack.c.h.bf16 %v952_v24  ;;  %v1104_v37 = vunpack.c.l.bf16 %v953_v31  ;;  %v966_v38 = vld [vmem:[%s1610_s1 + $0x8] sm:$0xff]   ;;  %v812_v39 = vld [vmem:[%s1608_s2 + $0x15] ss:$0 sm:$0xff]  ;;  %v1118_v42 = vunpack.c.l.bf16 %v888_v33 }
   0xa   :  { %613 = vperm.xlu1 %983, %v796_v5   ;;  %609 = vperm.xlu0 %982, %v795_v6   ;;  %v144_v32 = vmul.f32 %v1073_v23, %v1073_v23  ;;  %v145_v35 = vmul.f32 %v1078_v25, %v1078_v25  ;;  %v174_v36 = vadd.f32 %v143_v27, %v142_v26  ;;  %v811_v40 = vld [vmem:[%s1608_s2 + $0x14] ss:$0 sm:$0xff]  ;;  %v954_v41 = vld [vmem:[%s1609_s0 + $0x20] sm:$0xff]   ;;  %v1120_v43 = vunpack.c.h.bf16 %v888_v33  ;;  %v814_v53 = vld [vmem:[%s1608_s2 + $0x17] ss:$0 sm:$0xff] }
   0xb   :  { %v146_v44 = vmul.f32 %v1090_v30, %v1090_v30  ;;  %v1124_v46 = vunpack.c.h.bf16 %v953_v31  ;;  %v1126_v47 = vunpack.c.l.bf16 %v966_v38  ;;  %v147_v48 = vmul.f32 %v1100_v34, %v1100_v34  ;;  %v967_v52 = vld [vmem:[%s1610_s1 + $0x10] sm:$0xff]   ;;  %v955_v55 = vld [vmem:[%s1609_s0 + $0x28] sm:$0xff]   ;;  %v968_v62 = vld [vmem:[%s1610_s1 + $0x18] sm:$0xff]  }
   0xc   :  { %v175_v45 = vadd.f32 %v174_v36, %v144_v32  ;;  %v1130_v50 = vunpack.c.l.bf16 %v954_v41  ;;  %v1132_v51 = vunpack.c.h.bf16 %v966_v38  ;;  %v813_v54 = vld [vmem:[%s1608_s2 + $0x16] ss:$0 sm:$0xff]  ;;  %v148_v56 = vmul.f32 %v1104_v37, %v1104_v37  ;;  %v816_v4 = vld [vmem:[%s1608_s2 + $0x19] ss:$0 sm:$0xff]  ;;  %v815_v5 = vld [vmem:[%s1608_s2 + $0x18] ss:$0 sm:$0xff] }
   0xd   :  { %v207_v58 = vmul.f32 %v1118_v42, %v1118_v42  ;;  %v208_v59 = vmul.f32 %v1120_v43, %v1120_v43  ;;  %v1152_v60 = vunpack.c.h.bf16 %v954_v41  ;;  %v1154_v61 = vunpack.c.l.bf16 %v967_v52  ;;  %v956_v6 = vld [vmem:[%s1609_s0 + $0x30] sm:$0xff]   ;;  %v817_v24 = vld [vmem:[%s1608_s2 + $0x1a] ss:$0 sm:$0xff] }
   0xe   :  { %621 = vperm.xlu1 %983, %v798_v7   ;;  %617 = vperm.xlu0 %982, %v797_v8   ;;  %v176_v49 = vadd.f32 %v175_v45, %v145_v35  ;;  %v149_v63 = vmul.f32 %v1124_v46, %v1124_v46  ;;  %v209_v1 = vmul.f32 %v1126_v47, %v1126_v47  ;;  %v1163_v2 = vunpack.c.l.bf16 %v955_v55  ;;  %v957_v26 = vld [vmem:[%s1609_s0 + $0x38] sm:$0xff]   ;;  %v970_v35 = vld [vmem:[%s1610_s1 + $0x28] sm:$0xff]  }
   0xf   :  { %v1165_v3 = vunpack.c.h.bf16 %v967_v52  ;;  %v150_v7 = vmul.f32 %v1130_v50, %v1130_v50  ;;  %v1191_v18 = vunpack.c.l.bf16 %v956_v6  ;;  %v1208_v32 = vunpack.c.h.bf16 %v956_v6  ;;  %v820_v45 = vld [vmem:[%s1608_s2 + $0x1d] ss:$0 sm:$0xff]  ;;  %v821_v6 = vld [vmem:[%s1608_s2 + $0x1e] ss:$0 sm:$0xff] }
  0x10   :  { %v177_v57 = vadd.f32 %v176_v49, %v146_v44  ;;  %v152_v27 = vmul.f32 %v1163_v2, %v1163_v2  ;;  %v1219_v41 = vunpack.c.l.bf16 %v957_v26  ;;  %v958_v49 = vld [vmem:[%s1609_s0 + $0x40] sm:$0xff]  }
  0x11   :  { %v154_v52 = vmul.f32 %v1191_v18, %v1191_v18 }
  0x12   :  { %629 = vperm.xlu1 %983, %v800_v9   ;;  %625 = vperm.xlu0 %982, %v799_v10   ;;  %v178_v0 = vadd.f32 %v177_v57, %v147_v48  ;;  %v210_v9 = vmul.f32 %v1132_v51, %v1132_v51  ;;  %v239_v10 = vadd.f32 %v208_v59, %v207_v58  ;;  %v819_v48 = vld [vmem:[%s1608_s2 + $0x1c] ss:$0 sm:$0xff]  ;;  %v1238_v57 = vunpack.c.l.bf16 %v970_v35  ;;  %v971_v58 = vld [vmem:[%s1610_s1 + $0x30] sm:$0xff]  }
  0x13   :  { %v155_v59 = vmul.f32 %v1208_v32, %v1208_v32 }
  0x14   :  { %v179_v8 = vadd.f32 %v178_v0, %v148_v56  ;;  %v1236_v56 = vunpack.c.h.bf16 %v957_v26 }
  0x16   :  { %637 = vperm.xlu1 %983, %v802_v11   ;;  %633 = vperm.xlu0 %982, %v801_v12   ;;  %v1180_v11 = vunpack.c.h.bf16 %v955_v55  ;;  %v1182_v12 = vunpack.c.l.bf16 %v968_v62  ;;  %v180_v15 = vadd.f32 %v179_v8, %v149_v63  ;;  %v156_v8 = vmul.f32 %v1219_v41, %v1219_v41 }
  0x18   :  { %v153_v36 = vmul.f32 %v1180_v11, %v1180_v11 }
  0x1a   :  { %645 = vperm.xlu1 %983, %v804_v13   ;;  %641 = vperm.xlu0 %982, %v803_v14   ;;  %v969_v13 = vld [vmem:[%s1610_s1 + $0x20] sm:$0xff]   ;;  %v151_v14 = vmul.f32 %v1152_v60, %v1152_v60 }
  0x1b   :  { %v1210_v33 = vunpack.c.l.bf16 %v969_v13  ;;  %v1221_v44 = vunpack.c.h.bf16 %v969_v13 }
  0x1d   :  { %v215_v63 = vmul.f32 %v1210_v33, %v1210_v33 }
  0x1e   :  { %653 = vperm.xlu1 %983, %v806_v16   ;;  %649 = vperm.xlu0 %982, %v805_v17   ;;  %v211_v16 = vmul.f32 %v1154_v61, %v1154_v61  ;;  %v240_v17 = vadd.f32 %v239_v10, %v209_v1  ;;  %v1247_v1 = vunpack.c.l.bf16 %v958_v49  ;;  %v216_v10 = vmul.f32 %v1221_v44, %v1221_v44 }
  0x20   :  { %v241_v31 = vadd.f32 %v240_v17, %v210_v9  ;;  %v157_v17 = vmul.f32 %v1236_v56, %v1236_v56 }
  0x22   :  { %661 = vperm.xlu1 %983, %v808_v21   ;;  %657 = vperm.xlu0 %982, %v807_v22   ;;  %v1193_v21 = vunpack.c.h.bf16 %v968_v62  ;;  %v818_v22 = vld [vmem:[%s1608_s2 + $0x1b] ss:$0 sm:$0xff] }
  0x26   :  { %669 = vperm.xlu1 %983, %v810_v28   ;;  %665 = vperm.xlu0 %982, %v809_v29   ;;  %v181_v28 = vadd.f32 %v180_v15, %v150_v7  ;;  %v212_v29 = vmul.f32 %v1165_v3, %v1165_v3  ;;  %v959_v7 = vld [vmem:[%s1609_s0 + $0x48] sm:$0xff]   ;;  %v1266_v15 = vunpack.c.l.bf16 %v971_v58 }
  0x28   :  { %v182_v38 = vadd.f32 %v181_v28, %v151_v14  ;;  %v1264_v14 = vunpack.c.h.bf16 %v958_v49  ;;  %v1277_v28 = vunpack.c.h.bf16 %v971_v58  ;;  %v961_v58 = vld [vmem:[%s1609_s0 + $0x58] sm:$0xff]  }
  0x2a   :  { %677 = vperm.xlu1 %983, %v812_v39   ;;  %673 = vperm.xlu0 %982, %v811_v40   ;;  %v213_v39 = vmul.f32 %v1182_v12, %v1182_v12  ;;  %v242_v40 = vadd.f32 %v241_v31, %v211_v16  ;;  %v972_v16 = vld [vmem:[%s1610_s1 + $0x38] sm:$0xff]   ;;  %v158_v31 = vmul.f32 %v1247_v1, %v1247_v1 }
  0x2c   :  { %v243_v55 = vadd.f32 %v242_v40, %v212_v29  ;;  %v960_v29 = vld [vmem:[%s1609_s0 + $0x50] sm:$0xff]   ;;  %v1288_v40 = vunpack.c.l.bf16 %v972_v16 }
  0x2e   :  { %685 = vperm.xlu1 %983, %v814_v53   ;;  %681 = vperm.xlu0 %982, %v813_v54   ;;  %v183_v53 = vadd.f32 %v182_v38, %v152_v27  ;;  %v214_v54 = vmul.f32 %v1193_v21, %v1193_v21  ;;  %v244_v0 = vadd.f32 %v243_v55, %v213_v39  ;;  %v1275_v27 = vunpack.c.l.bf16 %v959_v7 }
  0x2f   :  { %v1286_v39 = vunpack.c.h.bf16 %v959_v7  ;;  %v1299_v55 = vunpack.c.h.bf16 %v972_v16  ;;  %v974_v7 = vld [vmem:[%s1610_s1 + $0x48] sm:$0xff]   ;;  %v1319_v16 = vunpack.c.l.bf16 %v961_v58 }
  0x30   :  { %v184_v62 = vadd.f32 %v183_v53, %v153_v36  ;;  %v245_v13 = vadd.f32 %v244_v0, %v214_v54  ;;  %v1297_v54 = vunpack.c.l.bf16 %v960_v29 }
  0x31   :  { %1630 = vst [vmem:[#allocation2_spill] sm:$0xff] %v1286_v39  ;;  %1633 = vst [vmem:[#allocation5_spill] sm:$0xff] %v1319_v16 }
  0x32   :  { %693 = vperm.xlu1 %983, %v816_v4   ;;  %689 = vperm.xlu0 %982, %v815_v5   ;;  %v1249_v4 = vunpack.c.h.bf16 %v970_v35  ;;  %v822_v5 = vld [vmem:[%s1608_s2 + $0x1f] ss:$0 sm:$0xff]  ;;  %v185_v9 = vadd.f32 %v184_v62, %v154_v52  ;;  %v246_v26 = vadd.f32 %v245_v13, %v215_v63  ;;  %v219_v52 = vmul.f32 %v1266_v15, %v1266_v15 }
  0x33   :  { %1631 = vst [vmem:[#allocation3_spill] sm:$0xff] %v1297_v54  ;;  %v220_v63 = vmul.f32 %v1277_v28, %v1277_v28 }
  0x34   :  { %v218_v36 = vmul.f32 %v1249_v4, %v1249_v4  ;;  %v247_v38 = vadd.f32 %v246_v26, %v216_v10  ;;  %v221_v10 = vmul.f32 %v1288_v40, %v1288_v40 }
  0x36   :  { %701 = vperm.xlu1 %983, %v818_v22   ;;  %697 = vperm.xlu0 %982, %v817_v24   ;;  %v186_v22 = vadd.f32 %v185_v9, %v155_v59  ;;  %v217_v24 = vmul.f32 %v1238_v57, %v1238_v57  ;;  %v160_v59 = vmul.f32 %v1275_v27, %v1275_v27 }
  0x38   :  { %v187_v35 = vadd.f32 %v186_v22, %v156_v8  ;;  %v248_v53 = vadd.f32 %v247_v38, %v217_v24  ;;  %v161_v8 = vmul.f32 %v1286_v39, %v1286_v39  ;;  %v962_v22 = vld [vmem:[%s1609_s0 + $0x60] sm:$0xff]   ;;  %v162_v24 = vmul.f32 %v1297_v54, %v1297_v54  ;;  %v975_v38 = vld [vmem:[%s1610_s1 + $0x50] sm:$0xff]  }
  0x3a   :  { %709 = vperm.xlu1 %983, %v820_v45   ;;  %705 = vperm.xlu0 %982, %v819_v48   ;;  %v973_v45 = vld [vmem:[%s1610_s1 + $0x40] sm:$0xff]   ;;  %v159_v48 = vmul.f32 %v1264_v14, %v1264_v14  ;;  %v188_v49 = vadd.f32 %v187_v35, %v157_v17  ;;  %v249_v0 = vadd.f32 %v248_v53, %v218_v36  ;;  %v1330_v35 = vunpack.c.h.bf16 %v961_v58  ;;  %v963_v58 = vld [vmem:[%s1609_s0 + $0x68] sm:$0xff]  }
  0x3b   :  { %v1321_v17 = vunpack.c.h.bf16 %v973_v45  ;;  %v1332_v36 = vunpack.c.l.bf16 %v974_v7  ;;  %v1341_v53 = vunpack.c.l.bf16 %v962_v22 }
  0x3c   :  { %v189_v62 = vadd.f32 %v188_v49, %v158_v31  ;;  %v250_v13 = vadd.f32 %v249_v0, %v219_v52  ;;  %1634 = vst [vmem:[#allocation6_spill] sm:$0xff] %v1330_v35 }
  0x3d   :  { %1635 = vst [vmem:[#allocation7_spill] sm:$0xff] %v1341_v53  ;;  %v224_v0 = vmul.f32 %v1321_v17, %v1321_v17 }
  0x3e   :  { %717 = vperm.xlu1 %983, %v822_v5   ;;  %713 = vperm.xlu0 %982, %v821_v6   ;;  %v1308_v5 = vunpack.c.h.bf16 %v960_v29  ;;  %v1310_v6 = vunpack.c.l.bf16 %v973_v45  ;;  %v190_v9 = vadd.f32 %v189_v62, %v159_v48  ;;  %v222_v29 = vmul.f32 %v1299_v55, %v1299_v55 }
  0x3f   :  { %v251_v31 = vadd.f32 %v250_v13, %v220_v63  ;;  %v164_v62 = vmul.f32 %v1319_v16, %v1319_v16  ;;  %v1354_v13 = vunpack.c.l.bf16 %v975_v38  ;;  %v1365_v16 = vunpack.c.h.bf16 %v975_v38  ;;  %v977_v38 = vld [vmem:[%s1610_s1 + $0x60] sm:$0xff]  }
  0x40   :  { %1632 = vst [vmem:[#allocation4_spill] sm:$0xff] %v1308_v5  ;;  %v191_v26 = vadd.f32 %v190_v9, %v160_v59  ;;  %v163_v45 = vmul.f32 %v1308_v5, %v1308_v5  ;;  %v223_v49 = vmul.f32 %v1310_v6, %v1310_v6  ;;  %v1343_v59 = vunpack.c.h.bf16 %v974_v7  ;;  %v976_v7 = vld [vmem:[%s1610_s1 + $0x58] sm:$0xff]  }
  0x41   :  { %v252_v52 = vadd.f32 %v251_v31, %v221_v10  ;;  %v1352_v9 = vunpack.c.h.bf16 %v962_v22  ;;  %1638 = vst [vmem:[#allocation10_spill] sm:$0xff] %v1354_v13  ;;  %v165_v10 = vmul.f32 %v1330_v35, %v1330_v35  ;;  %v225_v31 = vmul.f32 %v1332_v36, %v1332_v36  ;;  %1640 = vst [vmem:[#allocation12_spill] sm:$0xff] %v1365_v16  ;;  %v964_v22 = vld [vmem:[%s1609_s0 + $0x70] sm:$0xff]  }
  0x42   :  { %v192_v48 = vadd.f32 %v191_v26, %v161_v8  ;;  %1636 = vst [vmem:[#allocation8_spill] sm:$0xff] %v1343_v59  ;;  %v226_v35 = vmul.f32 %v1343_v59, %v1343_v59  ;;  %v1376_v5 = vunpack.c.l.bf16 %v976_v7  ;;  %v1387_v54 = vunpack.c.h.bf16 %v976_v7  ;;  %v978_v7 = vld [vmem:[%s1610_s1 + $0x68] sm:$0xff]  }
  0x43   :  { %v253_v8 = vadd.f32 %v252_v52, %v222_v29  ;;  %1637 = vst [vmem:[#allocation9_spill] sm:$0xff] %v1352_v9  ;;  %v166_v29 = vmul.f32 %v1341_v53, %v1341_v53  ;;  %v227_v53 = vmul.f32 %v1354_v13, %v1354_v13  ;;  %v1393_v39 = vunpack.c.h.bf16 %v964_v22 }
  0x44   :  { %v193_v63 = vadd.f32 %v192_v48, %v162_v24  ;;  %v1363_v48 = vunpack.c.l.bf16 %v963_v58  ;;  %1642 = vst [vmem:[#allocation14_spill] sm:$0xff] %v1376_v5  ;;  %1643 = vst [vmem:[#allocation15_spill] sm:$0xff] %v1387_v54  ;;  %v1415_v13 = vunpack.c.l.bf16 %v978_v7 }
  0x45   :  { %v254_v24 = vadd.f32 %v253_v8, %v223_v49  ;;  %v167_v49 = vmul.f32 %v1352_v9, %v1352_v9  ;;  %v1395_v9 = vunpack.c.l.bf16 %v977_v38 }
  0x46   :  { %v194_v26 = vadd.f32 %v193_v63, %v163_v45  ;;  %1639 = vst [vmem:[#allocation11_spill] sm:$0xff] %v1363_v48  ;;  %v1374_v63 = vunpack.c.h.bf16 %v963_v58  ;;  %v168_v58 = vmul.f32 %v1363_v48, %v1363_v48  ;;  %1646 = vst [vmem:[#allocation18_spill] sm:$0xff] %v1415_v13 }
  0x47   :  { %v255_v45 = vadd.f32 %v254_v24, %v224_v0  ;;  %v228_v24 = vmul.f32 %v1365_v16, %v1365_v16  ;;  %1644 = vst [vmem:[#allocation16_spill] sm:$0xff] %v1395_v9 }
  0x48   :  { %v195_v52 = vadd.f32 %v194_v26, %v164_v62  ;;  %1641 = vst [vmem:[#allocation13_spill] sm:$0xff] %v1374_v63  ;;  %v1385_v26 = vunpack.c.l.bf16 %v964_v22  ;;  %v1407_v22 = vunpack.c.h.bf16 %v977_v38  ;;  %v231_v38 = vmul.f32 %v1395_v9, %v1395_v9 }
  0x49   :  { %v256_v62 = vadd.f32 %v255_v45, %v225_v31  ;;  %v169_v31 = vmul.f32 %v1374_v63, %v1374_v63 }
  0x4a   :  { %v196_v8 = vadd.f32 %v195_v52, %v165_v10  ;;  %v965_v10 = vld [vmem:[%s1609_s0 + $0x78] sm:$0xff]   ;;  %v229_v52 = vmul.f32 %v1376_v5, %v1376_v5  ;;  %1645 = vst [vmem:[#allocation17_spill] sm:$0xff] %v1407_v22  ;;  %v170_v45 = vmul.f32 %v1385_v26, %v1385_v26 }
  0x4b   :  { %v257_v59 = vadd.f32 %v256_v62, %v226_v35  ;;  %v230_v62 = vmul.f32 %v1387_v54, %v1387_v54  ;;  %v1413_v16 = vunpack.c.l.bf16 %v965_v10  ;;  %v1428_v63 = vunpack.c.h.bf16 %v965_v10  ;;  %v980_v5 = vld [vmem:[%s1610_s1 + $0x78] sm:$0xff]  }
  0x4c   :  { %v197_v0 = vadd.f32 %v196_v8, %v166_v29 }
  0x4d   :  { %v258_v35 = vadd.f32 %v257_v59, %v227_v53  ;;  %v171_v53 = vmul.f32 %v1393_v39, %v1393_v39 }
  0x4e   :  { %v198_v29 = vadd.f32 %v197_v0, %v167_v49  ;;  %v979_v49 = vld [vmem:[%s1610_s1 + $0x70] sm:$0xff]   ;;  %v1424_v0 = vunpack.c.h.bf16 %v978_v7 }
  0x4f   :  { %v259_v48 = vadd.f32 %v258_v35, %v228_v24  ;;  %v232_v24 = vmul.f32 %v1407_v22, %v1407_v22  ;;  %v1430_v54 = vunpack.c.l.bf16 %v979_v49 }
  0x50   :  { %v199_v8 = vadd.f32 %v198_v29, %v168_v58  ;;  %1647 = vst [vmem:[#allocation19_spill] sm:$0xff] %v1424_v0  ;;  %v234_v10 = vmul.f32 %v1424_v0, %v1424_v0 }
  0x51   :  { %v260_v58 = vadd.f32 %v259_v48, %v229_v52  ;;  %v233_v48 = vmul.f32 %v1415_v13, %v1415_v13  ;;  %v1439_v52 = vunpack.c.h.bf16 %v979_v49  ;;  %v235_v22 = vmul.f32 %v1430_v54, %v1430_v54 }
  0x52   :  { %v200_v59 = vadd.f32 %v199_v8, %v169_v31  ;;  %v172_v31 = vmul.f32 %v1413_v16, %v1413_v16 }
  0x53   :  { %v261_v35 = vadd.f32 %v260_v58, %v230_v62  ;;  %v1443_v62 = vunpack.c.l.bf16 %v980_v5  ;;  %v236_v49 = vmul.f32 %v1439_v52, %v1439_v52 }
  0x54   :  { %v201_v29 = vadd.f32 %v200_v59, %v170_v45  ;;  %v173_v59 = vmul.f32 %v1428_v63, %v1428_v63 }
  0x55   :  { %v262_v7 = vadd.f32 %v261_v35, %v231_v38 }
  0x56   :  { %v202_v8 = vadd.f32 %v201_v29, %v171_v53  ;;  %v1449_v29 = vunpack.c.h.bf16 %v980_v5 }
  0x57   :  { %v263_v45 = vadd.f32 %v262_v7, %v232_v24  ;;  %v237_v24 = vmul.f32 %v1443_v62, %v1443_v62 }
  0x58   :  { %v203_v58 = vadd.f32 %v202_v8, %v172_v31  ;;  %v238_v0 = vmul.f32 %v1449_v29, %v1449_v29 }
  0x59   :  { %v264_v53 = vadd.f32 %v263_v45, %v233_v48 }
  0x5a   :  { %v204_v35 = vadd.f32 %v203_v58, %v173_v59 }
  0x5b   :  { %v265_v38 = vadd.f32 %v264_v53, %v234_v10 }
  0x5c   :  { %v205_v31 = vadd.f32 1e-20, %v204_v35 }
  0x5d   :  { %v266_v7 = vadd.f32 %v265_v38, %v235_v22 }
  0x5e   :  { %984 = vrsqrt.f32 %v205_v31 }
  0x5f   :  { %v267_v13 = vadd.f32 %v266_v7, %v236_v49 }
  0x61   :  { %v268_v8 = vadd.f32 %v267_v13, %v237_v24 }
  0x63   :  { %v269_v9 = vadd.f32 %v268_v8, %v238_v0 }
  0x65   :  { %v270_v48 = vadd.f32 1e-20, %v269_v9 }
  0x67   :  { %986 = vrsqrt.f32 %v270_v48 }
  0x68   :  { %v1457_v5 = vpop.eup %984 }
  0x69   :  { %v272_v10 = vmul.f32 %v1457_v5, %v1063_v19  ;;  %v273_v59 = vmul.f32 %v1457_v5, %v1065_v20  ;;  %v274_v9 = vmul.f32 %v1457_v5, %v1073_v23  ;;  %v275_v53 = vmul.f32 %v1457_v5, %v1078_v25 }
  0x6a   :  { %v276_v20 = vmul.f32 %v1457_v5, %v1090_v30 }
  0x71   :  { %v1459_v45 = vpop.eup %986 }
  0x72   :  { %v304_v22 = vmul.f32 %v1459_v45, %v1118_v42  ;;  %v305_v13 = vmul.f32 %v1459_v45, %v1120_v43  ;;  %v306_v0 = vmul.f32 %v1459_v45, %v1126_v47  ;;  %v307_v19 = vmul.f32 %v1459_v45, %v1132_v51 }
  0x73   :  { %v308_v43 = vmul.f32 %v1459_v45, %v1154_v61  ;;  %v277_v47 = vmul.f32 %v1457_v5, %v1100_v34  ;;  %v309_v25 = vmul.f32 %v1459_v45, %v1165_v3  ;;  %v278_v51 = vmul.f32 %v1457_v5, %v1104_v37 }
  0x74   :  { %v336_v58 = vsub.f32 %v272_v10, %v304_v22  ;;  %v337_v42 = vsub.f32 %v273_v59, %v305_v13  ;;  %v338_v49 = vsub.f32 %v274_v9, %v306_v0  ;;  %v339_v24 = vsub.f32 %v275_v53, %v307_v19 }
  0x75   :  { %v310_v30 = vmul.f32 %v1459_v45, %v1182_v12  ;;  %v340_v8 = vsub.f32 %v276_v20, %v308_v43  ;;  %v279_v10 = vmul.f32 %v1457_v5, %v1124_v46  ;;  %v311_v34 = vmul.f32 %v1459_v45, %v1193_v21 }
  0x76   :  { %v368_v35 = vmul.f32 %v336_v58, %v336_v58  ;;  %v369_v7 = vmul.f32 %v337_v42, %v337_v42  ;;  %v370_v31 = vmul.f32 %v338_v49, %v338_v49  ;;  %v371_v59 = vmul.f32 %v339_v24, %v339_v24 }
  0x77   :  { %v341_v3 = vsub.f32 %v277_v47, %v309_v25  ;;  %v342_v9 = vsub.f32 %v278_v51, %v310_v30  ;;  %v280_v37 = vmul.f32 %v1457_v5, %v1130_v50  ;;  %v372_v58 = vmul.f32 %v340_v8, %v340_v8 }
  0x78   :  { %v312_v53 = vmul.f32 %v1459_v45, %v1210_v33  ;;  %v343_v46 = vsub.f32 %v279_v10, %v311_v34  ;;  %v281_v21 = vmul.f32 %v1457_v5, %v1152_v60  ;;  %v283_v50 = vmul.f32 %v1457_v5, %v1180_v11 }
  0x79   :  { %v373_v43 = vmul.f32 %v341_v3, %v341_v3  ;;  %v314_v33 = vmul.f32 %v1459_v45, %v1238_v57  ;;  %v285_v47 = vmul.f32 %v1457_v5, %v1208_v32  ;;  %v374_v24 = vmul.f32 %v342_v9, %v342_v9 }
  0x7a   :  { %v375_v51 = vmul.f32 %v343_v46, %v343_v46  ;;  %v286_v11 = vmul.f32 %v1457_v5, %v1219_v41  ;;  %v315_v32 = vmul.f32 %v1459_v45, %v1249_v4  ;;  %v300_v10 = vmul.f32 %v1457_v5, %v1385_v26 }
  0x7b   :  { %v317_v4 = vmul.f32 %v1459_v45, %v1277_v28  ;;  %v332_v26 = vmul.f32 %v1459_v45, %v1430_v54  ;;  %v335_v28 = vmul.f32 %v1459_v45, %v1449_v29  ;;  %v334_v54 = vmul.f32 %v1459_v45, %v1443_v62 }
  0x7c   :  { %v288_v62 = vmul.f32 %v1457_v5, %v1247_v1  ;;  %v290_v1 = vmul.f32 %v1457_v5, %v1275_v27 }
  0x7d   :  { %v349_v46 = vsub.f32 %v285_v47, %v317_v4  ;;  %v1651_v4 = vld [vmem:[#allocation10_spill] sm:$0xff] }
  0x81   :  { %v602_v38 = vpop.permute.xlu1 %601  ;;  %v594_v23 = vpop.permute.xlu0 %593 }
  0x82   :  { %v720_v22 = vmul.f32 %v594_v23, %v368_v35  ;;  %v722_v0 = vmul.f32 %v602_v38, %v370_v31  ;;  %v313_v23 = vmul.f32 %v1459_v45, %v1221_v44  ;;  %v282_v38 = vmul.f32 %v1457_v5, %v1163_v2 }
  0x83   :  { %v284_v44 = vmul.f32 %v1457_v5, %v1191_v18  ;;  %v301_v2 = vmul.f32 %v1457_v5, %v1393_v39  ;;  %v303_v18 = vmul.f32 %v1457_v5, %v1428_v63  ;;  %v333_v39 = vmul.f32 %v1459_v45, %v1439_v52 }
  0x84   :  { %v345_v8 = vsub.f32 %v281_v21, %v313_v23  ;;  %v302_v63 = vmul.f32 %v1457_v5, %v1413_v16  ;;  %v287_v21 = vmul.f32 %v1457_v5, %v1236_v56  ;;  %v320_v56 = vmul.f32 %v1459_v45, %v1310_v6 }
  0x85   :  { %v606_v61 = vpop.permute.xlu1 %605  ;;  %v598_v48 = vpop.permute.xlu0 %597  ;;  %v1533_v52 = vsub.f32 %v301_v2, %v333_v39 }
  0x86   :  { %v721_v13 = vmul.f32 %v598_v48, %v369_v7  ;;  %v723_v49 = vmul.f32 %v606_v61, %v371_v59  ;;  %v344_v7 = vsub.f32 %v280_v37, %v312_v53  ;;  %v346_v61 = vsub.f32 %v282_v38, %v314_v33 }
  0x87   :  { %v316_v48 = vmul.f32 %v1459_v45, %v1266_v15  ;;  %v318_v15 = vmul.f32 %v1459_v45, %v1288_v40  ;;  %v377_v37 = vmul.f32 %v345_v8, %v345_v8 }
  0x88   :  { %v752_v12 = vadd.f32 %v721_v13, %v720_v22  ;;  %v376_v22 = vmul.f32 %v344_v7, %v344_v7  ;;  %v289_v7 = vmul.f32 %v1457_v5, %v1264_v14  ;;  %v1648_v14 = vld [vmem:[#allocation2_spill] sm:$0xff] }
  0x89   :  { %v614_v19 = vpop.permute.xlu1 %613  ;;  %v610_v42 = vpop.permute.xlu0 %609  ;;  %v350_v38 = vsub.f32 %v286_v11, %v318_v15  ;;  %v322_v11 = vmul.f32 %v1459_v45, %v1332_v36  ;;  %v324_v15 = vmul.f32 %v1459_v45, %v1651_v4  ;;  %v1664_v4 = vld [vmem:[#allocation13_spill] sm:$0xff] }
  0x8a   :  { %v753_v20 = vadd.f32 %v752_v12, %v722_v0  ;;  %v724_v35 = vmul.f32 %v610_v42, %v372_v58  ;;  %v725_v57 = vmul.f32 %v614_v19, %v373_v43  ;;  %v347_v0 = vsub.f32 %v283_v50, %v315_v32 }
  0x8b   :  { %v348_v12 = vsub.f32 %v284_v44, %v316_v48  ;;  %v1535_v58 = vsub.f32 %v300_v10, %v332_v26  ;;  %v378_v19 = vmul.f32 %v346_v61, %v346_v61  ;;  %v1547_v50 = vsub.f32 %v302_v63, %v334_v54  ;;  %v1654_v54 = vld [vmem:[#allocation5_spill] sm:$0xff] }
  0x8c   :  { %v754_v60 = vadd.f32 %v753_v20, %v723_v49  ;;  %v319_v49 = vmul.f32 %v1459_v45, %v1299_v55  ;;  %v1545_v20 = vsub.f32 %v303_v18, %v335_v28  ;;  %v379_v29 = vmul.f32 %v347_v0, %v347_v0 }
  0x8d   :  { %v622_v25 = vpop.permute.xlu1 %621  ;;  %v618_v30 = vpop.permute.xlu0 %617  ;;  %v380_v47 = vmul.f32 %v348_v12, %v348_v12  ;;  %v321_v44 = vmul.f32 %v1459_v45, %v1321_v17  ;;  %v291_v48 = vmul.f32 %v1457_v5, %v1648_v14  ;;  %v1649_v17 = vld [vmem:[#allocation8_spill] sm:$0xff]  ;;  %v354_v27 = vsub.f32 %v290_v1, %v322_v11 }
  0x8e   :  { %v755_v31 = vadd.f32 %v754_v60, %v724_v35  ;;  %v726_v41 = vmul.f32 %v618_v30, %v374_v24  ;;  %v727_v3 = vmul.f32 %v622_v25, %v375_v51  ;;  %v351_v55 = vsub.f32 %v287_v21, %v319_v49  ;;  %v1655_v49 = vld [vmem:[#allocation14_spill] sm:$0xff] }
  0x8f   :  { %v381_v30 = vmul.f32 %v349_v46, %v349_v46 }
  0x90   :  { %v756_v34 = vadd.f32 %v755_v31, %v725_v57  ;;  %v382_v57 = vmul.f32 %v350_v38, %v350_v38  ;;  %v352_v31 = vsub.f32 %v288_v62, %v320_v56  ;;  %v383_v32 = vmul.f32 %v351_v55, %v351_v55  ;;  %v1656_v62 = vld [vmem:[#allocation6_spill] sm:$0xff]  ;;  %v1658_v55 = vld [vmem:[#allocation7_spill] sm:$0xff] }
  0x91   :  { %v630_v59 = vpop.permute.xlu1 %629  ;;  %v626_v13 = vpop.permute.xlu0 %625 }
  0x92   :  { %v757_v9 = vadd.f32 %v756_v34, %v726_v41  ;;  %v728_v53 = vmul.f32 %v626_v13, %v376_v22  ;;  %v729_v43 = vmul.f32 %v630_v59, %v377_v37  ;;  %v353_v41 = vsub.f32 %v289_v7, %v321_v44  ;;  %v1650_v22 = vld [vmem:[#allocation3_spill] sm:$0xff]  ;;  %v1653_v37 = vld [vmem:[#allocation12_spill] sm:$0xff] }
  0x93   :  { %v323_v34 = vmul.f32 %v1459_v45, %v1649_v17  ;;  %v292_v36 = vmul.f32 %v1457_v5, %v1650_v22  ;;  %v384_v13 = vmul.f32 %v352_v31, %v352_v31  ;;  %v325_v0 = vmul.f32 %v1459_v45, %v1653_v37  ;;  %v1660_v31 = vld [vmem:[#allocation9_spill] sm:$0xff] }
  0x94   :  { %v758_v40 = vadd.f32 %v757_v9, %v727_v3  ;;  %v1652_v3 = vld [vmem:[#allocation4_spill] sm:$0xff]  ;;  %v296_v7 = vmul.f32 %v1457_v5, %v1658_v55 }
  0x95   :  { %v638_v42 = vpop.permute.xlu1 %637  ;;  %v634_v16 = vpop.permute.xlu0 %633  ;;  %v293_v9 = vmul.f32 %v1457_v5, %v1652_v3  ;;  %v356_v21 = vsub.f32 %v292_v36, %v324_v15  ;;  %v1663_v36 = vld [vmem:[#allocation18_spill] sm:$0xff]  ;;  %v299_v15 = vmul.f32 %v1457_v5, %v1664_v4 }
  0x96   :  { %v759_v23 = vadd.f32 %v758_v40, %v728_v53  ;;  %v730_v33 = vmul.f32 %v634_v16, %v378_v19  ;;  %v731_v25 = vmul.f32 %v638_v42, %v379_v29  ;;  %v385_v53 = vmul.f32 %v353_v41, %v353_v41  ;;  %v1662_v41 = vld [vmem:[#allocation11_spill] sm:$0xff] }
  0x97   :  { %v355_v40 = vsub.f32 %v291_v48, %v323_v34  ;;  %v386_v19 = vmul.f32 %v354_v27, %v354_v27  ;;  %v294_v42 = vmul.f32 %v1457_v5, %v1654_v54  ;;  %v357_v38 = vsub.f32 %v293_v9, %v325_v0  ;;  %v1661_v48 = vld [vmem:[#allocation17_spill] sm:$0xff] }
  0x98   :  { %v760_v35 = vadd.f32 %v759_v23, %v729_v43  ;;  %v326_v43 = vmul.f32 %v1459_v45, %v1655_v49  ;;  %v388_v1 = vmul.f32 %v356_v21, %v356_v21  ;;  %v298_v17 = vmul.f32 %v1457_v5, %v1662_v41 }
  0x99   :  { %v646_v60 = vpop.permute.xlu1 %645  ;;  %v642_v24 = vpop.permute.xlu0 %641  ;;  %v387_v56 = vmul.f32 %v355_v40, %v355_v40 }
  0x9a   :  { %v761_v51 = vadd.f32 %v760_v35, %v730_v33  ;;  %v732_v2 = vmul.f32 %v642_v24, %v380_v47  ;;  %v733_v10 = vmul.f32 %v646_v60, %v381_v30  ;;  %v295_v33 = vmul.f32 %v1457_v5, %v1656_v62  ;;  %v1657_v60 = vld [vmem:[#allocation15_spill] sm:$0xff] }
  0x9b   :  { %v327_v24 = vmul.f32 %v1459_v45, %v1657_v60  ;;  %v358_v11 = vsub.f32 %v294_v42, %v326_v43 }
  0x9c   :  { %v762_v6 = vadd.f32 %v761_v51, %v731_v25  ;;  %v1659_v25 = vld [vmem:[#allocation16_spill] sm:$0xff] }
  0x9d   :  { %v654_v8 = vpop.permute.xlu1 %653  ;;  %v650_v61 = vpop.permute.xlu0 %649  ;;  %v328_v51 = vmul.f32 %v1459_v45, %v1659_v25  ;;  %v359_v14 = vsub.f32 %v295_v33, %v327_v24  ;;  %v390_v22 = vmul.f32 %v358_v11, %v358_v11 }
  0x9e   :  { %v763_v18 = vadd.f32 %v762_v6, %v732_v2  ;;  %v734_v39 = vmul.f32 %v650_v61, %v382_v57  ;;  %v735_v12 = vmul.f32 %v654_v8, %v383_v32  ;;  %v389_v6 = vmul.f32 %v357_v38, %v357_v38 }
  0x9f   :  { %v297_v8 = vmul.f32 %v1457_v5, %v1660_v31  ;;  %v391_v37 = vmul.f32 %v359_v14, %v359_v14 }
  0xa0   :  { %v764_v59 = vadd.f32 %v763_v18, %v733_v10  ;;  %v329_v10 = vmul.f32 %v1459_v45, %v1661_v48  ;;  %v360_v18 = vsub.f32 %v296_v7, %v328_v51  ;;  %v397_v7 = vmul.f32 %v1533_v52, %v1533_v52 }
  0xa1   :  { %v662_v26 = vpop.permute.xlu1 %661  ;;  %v658_v63 = vpop.permute.xlu0 %657 }
  0xa2   :  { %v765_v28 = vadd.f32 %v764_v59, %v734_v39  ;;  %v736_v16 = vmul.f32 %v658_v63, %v384_v13  ;;  %v737_v35 = vmul.f32 %v662_v26, %v385_v53  ;;  %v330_v39 = vmul.f32 %v1459_v45, %v1663_v36  ;;  %v1665_v26 = vld [vmem:[#allocation19_spill] sm:$0xff] }
  0xa3   :  { %v331_v63 = vmul.f32 %v1459_v45, %v1665_v26  ;;  %v361_v0 = vsub.f32 %v297_v8, %v329_v10  ;;  %v392_v53 = vmul.f32 %v360_v18, %v360_v18 }
  0xa4   :  { %v766_v46 = vadd.f32 %v765_v28, %v735_v12  ;;  %v362_v40 = vsub.f32 %v298_v17, %v330_v39 }
  0xa5   :  { %v670_v23 = vpop.permute.xlu1 %669  ;;  %v666_v29 = vpop.permute.xlu0 %665  ;;  %v363_v21 = vsub.f32 %v299_v15, %v331_v63 }
  0xa6   :  { %v767_v47 = vadd.f32 %v766_v46, %v736_v16  ;;  %v738_v30 = vmul.f32 %v666_v29, %v386_v19  ;;  %v739_v32 = vmul.f32 %v670_v23, %v387_v56  ;;  %v393_v46 = vmul.f32 %v361_v0, %v361_v0 }
  0xa7   :  { %v394_v5 = vmul.f32 %v362_v40, %v362_v40  ;;  %v395_v62 = vmul.f32 %v363_v21, %v363_v21 }
  0xa8   :  { %v768_v44 = vadd.f32 %v767_v47, %v737_v35  ;;  %v396_v47 = vmul.f32 %v1535_v58, %v1535_v58 }
  0xa9   :  { %v678_v2 = vpop.permute.xlu1 %677  ;;  %v674_v57 = vpop.permute.xlu0 %673 }
  0xaa   :  { %v769_v61 = vadd.f32 %v768_v44, %v738_v30  ;;  %v740_v34 = vmul.f32 %v674_v57, %v388_v1  ;;  %v741_v3 = vmul.f32 %v678_v2, %v389_v6  ;;  %v398_v30 = vmul.f32 %v1547_v50, %v1547_v50 }
  0xab   :  { %v399_v2 = vmul.f32 %v1545_v20, %v1545_v20 }
  0xac   :  { %v770_v27 = vadd.f32 %v769_v61, %v739_v32 }
  0xad   :  { %v686_v59 = vpop.permute.xlu1 %685  ;;  %v682_v13 = vpop.permute.xlu0 %681 }
  0xae   :  { %v771_v9 = vadd.f32 %v770_v27, %v740_v34  ;;  %v742_v12 = vmul.f32 %v682_v13, %v390_v22  ;;  %v743_v42 = vmul.f32 %v686_v59, %v391_v37 }
  0xb0   :  { %v772_v28 = vadd.f32 %v771_v9, %v741_v3 }
  0xb1   :  { %v694_v19 = vpop.permute.xlu1 %693  ;;  %v690_v54 = vpop.permute.xlu0 %689 }
  0xb2   :  { %v773_v16 = vadd.f32 %v772_v28, %v742_v12  ;;  %v744_v49 = vmul.f32 %v690_v54, %v392_v53  ;;  %v745_v45 = vmul.f32 %v694_v19, %v393_v46 }
  0xb4   :  { %v774_v43 = vadd.f32 %v773_v16, %v743_v42 }
  0xb5   :  { %v702_v23 = vpop.permute.xlu1 %701  ;;  %v698_v29 = vpop.permute.xlu0 %697 }
  0xb6   :  { %v775_v38 = vadd.f32 %v774_v43, %v744_v49  ;;  %v746_v33 = vmul.f32 %v698_v29, %v394_v5  ;;  %v747_v24 = vmul.f32 %v702_v23, %v395_v62 }
  0xb8   :  { %v776_v35 = vadd.f32 %v775_v38, %v745_v45 }
  0xb9   :  { %v710_v56 = vpop.permute.xlu1 %709  ;;  %v706_v60 = vpop.permute.xlu0 %705 }
  0xba   :  { %v777_v55 = vadd.f32 %v776_v35, %v746_v33  ;;  %v748_v25 = vmul.f32 %v706_v60, %v396_v47  ;;  %v749_v1 = vmul.f32 %v710_v56, %v397_v7 }
  0xbc   :  { %v778_v51 = vadd.f32 %v777_v55, %v747_v24 }
  0xbd   :  { %v714_v44 = vpop.permute.xlu0 %713  ;;  %v718_v6 = vpop.permute.xlu1 %717 }
  0xbe   :  { %v779_v11 = vadd.f32 %v778_v51, %v748_v25  ;;  %v750_v58 = vmul.f32 %v714_v44, %v398_v30  ;;  %v751_v31 = vmul.f32 %v718_v6, %v399_v2 }
  0xc0   :  { %v780_v57 = vadd.f32 %v779_v11, %v749_v1 }
  0xc2   :  { %v781_v8 = vadd.f32 %v780_v57, %v750_v58 }
  0xc4   :  { %v782_v32 = vadd.f32 %v781_v8, %v751_v31 }
  0xc6   :  { %783 = vadd.xlane.f32.xlu0 %v782_v32 }
 0x153   :  { %v784_v52 = vpop.xlane.xlu0 %783 }
 0x154   :  { %786 = vst.msk [vmem:[%s1611_s3] sm:$0xff] %vm785_vm0, %v784_v52 }

</bundles_post_ra>
